<compile_context>
chip_gen: v5e
topology: v5e:2x2
jax: 0.10.0
libtpu: 0.0.40
codegen_flags: <defaults>
</compile_context>

<pallas_src>
import functools
import math

import jax
import jax.numpy as jnp
from jax.experimental import pallas as pl
from jax.experimental.pallas import tpu as pltpu


def _layer_norm(x, gamma, beta, eps=1e-5):
    mu = jnp.mean(x, axis=-1, keepdims=True)
    var = jnp.mean((x - mu) ** 2, axis=-1, keepdims=True)
    return (x - mu) * jax.lax.rsqrt(var + eps) * gamma + beta


def _gelu_exact(x):
    # torch nn.GELU() default = exact erf GELU
    return 0.5 * x * (1.0 + jax.lax.erf(x * (1.0 / math.sqrt(2.0))))


def encoder_block_kernel(
    x_ref,
    ln1_g_ref, ln1_b_ref,
    wq_ref, bq_ref, wk_ref, bk_ref, wv_ref, bv_ref, wo_ref, bo_ref,
    ln2_g_ref, ln2_b_ref,
    w1_ref, b1_ref, w2_ref, b2_ref,
    o_ref,
    k_cache, v_cache, xn_cache,
    *, num_head, tq,
):
    H = num_head
    qi = pl.program_id(1)

    # ---- once per batch block: LN(x) for the whole sequence + K/V caches ----
    @pl.when(qi == 0)
    def _():
        xn = _layer_norm(x_ref[0], ln1_g_ref[...], ln1_b_ref[...])   # (S, D) f32
        xn_bf = xn.astype(jnp.bfloat16)
        xn_cache[...] = xn_bf
        # Small static loop over heads: leading-dim weight indexing + immediate scratch
        # store (no lane slices, no concat; live range = one (S, dh) tile). Runs once
        # per batch block.
        for h in range(H):
            kh = jnp.dot(xn_bf, wk_ref[h], preferred_element_type=jnp.float32) + bk_ref[h]
            vh = jnp.dot(xn_bf, wv_ref[h], preferred_element_type=jnp.float32) + bv_ref[h]
            k_cache[h] = kh.astype(jnp.bfloat16)
            v_cache[h] = vh.astype(jnp.bfloat16)

    # ------------------------------- per query tile -------------------------------
    row0 = pl.multiple_of(qi * tq, tq)
    x_q = x_ref[0, pl.ds(row0, tq), :]                     # (tq, D) f32  (residual)
    xn_q_bf = xn_cache[pl.ds(row0, tq), :]                 # (tq, D) bf16 (pre-normalized)
    D = x_q.shape[-1]

    # Q projection for all heads as one batched matmul (softmax scale folded into wq/bq).
    xn_b = jnp.broadcast_to(xn_q_bf[None, :, :], (H, tq, D))
    q3 = jnp.einsum("hqd,hde->hqe", xn_b, wq_ref[...],
                    preferred_element_type=jnp.float32) + bq_ref[...]
    q3 = q3.astype(jnp.bfloat16)                           # (H, tq, dh)

    k3 = k_cache[...]                                      # (H, S, dh) bf16
    v3 = v_cache[...]

    # Batched-head attention: no explicit transpose (contract on the head dim directly).
    s = jnp.einsum("hqd,hkd->hqk", q3, k3,
                   preferred_element_type=jnp.float32)     # (H, tq, S) f32
    s = s - jnp.max(s, axis=-1, keepdims=True)
    p = jnp.exp(s)
    denom = jnp.sum(p, axis=-1, keepdims=True)             # (H, tq, 1)
    ctx = jnp.einsum("hqk,hkd->hqd", p.astype(jnp.bfloat16), v3,
                     preferred_element_type=jnp.float32)   # (H, tq, dh) f32
    ctx = ctx * pl.reciprocal(denom, approx=True)          # softmax norm on the EUP slot

    # Output projection: per-head batched matmul summed over heads == concat(ctx) @ Wo.
    o_heads = jnp.einsum("hqd,hde->hqe", ctx.astype(jnp.bfloat16), wo_ref[...],
                         preferred_element_type=jnp.float32)   # (H, tq, D) f32
    attn = jnp.sum(o_heads, axis=0) + bo_ref[...]
    # TODO(synk): dropout omitted (inference mode / identity).
    h1 = x_q + attn

    # ---- sublayer 2: LN -> Linear -> GELU -> Linear -> residual ----
    hn = _layer_norm(h1, ln2_g_ref[...], ln2_b_ref[...])
    f = jnp.dot(hn.astype(jnp.bfloat16), w1_ref[...],
                preferred_element_type=jnp.float32) + b1_ref[...]
    f = _gelu_exact(f)
    f = jnp.dot(f.astype(jnp.bfloat16), w2_ref[...],
                preferred_element_type=jnp.float32) + b2_ref[...]

    o_ref[0] = (h1 + f).astype(o_ref.dtype)                # one fused (tq, D) store


def _pick_query_tile(S):
    for cand in (256, 128):
        if S % cand == 0:
            return cand
    return S  # small sequences: single tile (block == full seq satisfies the (8,128) rule)


def encoder_block(x, params, num_head):
    B, S, D = x.shape
    assert D % num_head == 0
    dh = D // num_head
    d_ff = params["w1"].shape[-1]
    tq = _pick_query_tile(S)
    nq = S // tq
    scale = 1.0 / math.sqrt(dh)
    bf16 = jnp.bfloat16

    # Head-split the attention weights outside the kernel (free) and fold the softmax
    # scale into Q's weights/bias; store all matmul weights as bf16.
    wq_h = (params["wq"] * scale).astype(bf16).reshape(D, num_head, dh).transpose(1, 0, 2)
    wk_h = params["wk"].astype(bf16).reshape(D, num_head, dh).transpose(1, 0, 2)
    wv_h = params["wv"].astype(bf16).reshape(D, num_head, dh).transpose(1, 0, 2)
    wo_h = params["wo"].astype(bf16).reshape(num_head, dh, D)
    bq_h = (params["bq"] * scale).astype(jnp.float32).reshape(num_head, 1, dh)
    bk_h = params["bk"].astype(jnp.float32).reshape(num_head, 1, dh)
    bv_h = params["bv"].astype(jnp.float32).reshape(num_head, 1, dh)
    w1 = params["w1"].astype(bf16)
    w2 = params["w2"].astype(bf16)

    # Weights/biases: untiled, resident in VMEM (no per-grid-step double buffering).
    vmem_spec = pl.BlockSpec(memory_space=pltpu.MemorySpace.VMEM)
    in_specs = [pl.BlockSpec((1, S, D), lambda b, q: (b, 0, 0))] + [vmem_spec] * 16

    args = (
        x,
        params["ln1_g"], params["ln1_b"],
        wq_h, bq_h, wk_h, bk_h, wv_h, bv_h, wo_h, params["bo"],
        params["ln2_g"], params["ln2_b"],
        w1, params["b1"], w2, params["b2"],
    )

    # Explicit VMEM budget from the actual resident buffers (lane-padded), with headroom.
    lane = 128
    weight_bytes = 2 * (4 * D * max(D, lane) + 2 * max(D, lane) * max(d_ff, lane))
    cache_bytes = (2 * 2 * num_head * S * max(dh, lane)            # bf16 K/V caches
                   + 2 * S * max(D, lane))                         # bf16 LN(x) cache
    io_bytes = 4 * S * max(D, lane) * 2 + 4 * tq * max(D, lane) * 2  # x block + out tile
    act_bytes = (6 * num_head * tq * max(S, lane)                  # scores f32 + p bf16
                 + 6 * tq * max(d_ff, lane)                        # FFN intermediate
                 + 12 * tq * max(D, lane) * 4)                     # misc (tq, D) temps
    vmem_limit = int(min(max(2 * (weight_bytes + cache_bytes + io_bytes + act_bytes),
                             16 * 1024 * 1024),
                         64 * 1024 * 1024))                        # v7x-safe cap

    return pl.pallas_call(
        functools.partial(encoder_block_kernel, num_head=num_head, tq=tq),
        out_shape=jax.ShapeDtypeStruct((B, S, D), x.dtype),
        grid_spec=pltpu.PrefetchScalarGridSpec(
            num_scalar_prefetch=0,
            grid=(B, nq),
            in_specs=in_specs,
            out_specs=pl.BlockSpec((1, tq, D), lambda b, q: (b, q, 0)),
            scratch_shapes=[
                pltpu.VMEM((num_head, S, dh), bf16),   # K cache (head-major)
                pltpu.VMEM((num_head, S, dh), bf16),   # V cache (head-major)
                pltpu.VMEM((S, D), bf16),              # LN(x) cache for the batch block
            ],
        ),
        compiler_params=pltpu.CompilerParams(
            # Batch is megacore-parallel; the query-tile axis must stay sequential
            # ("arbitrary") because it reuses the K/V + LN caches written at qi == 0.
            dimension_semantics=("parallel", "arbitrary"),
            vmem_limit_bytes=vmem_limit,
        ),
    )(*args)


def init_params(key, d_model, d_ff):
    keys = jax.random.split(key, 8)
    std = 0.02

    def lin(k, fan_in, fan_out):
        return jax.random.normal(k, (fan_in, fan_out), jnp.float32) * std

    # Biases as (1, N) rows so they are 2-D for TPU layout.
    return {
        "ln1_g": jnp.ones((1, d_model), jnp.float32),
        "ln1_b": jnp.zeros((1, d_model), jnp.float32),
        "wq": lin(keys[0], d_model, d_model), "bq": jnp.zeros((1, d_model), jnp.float32),
        "wk": lin(keys[1], d_model, d_model), "bk": jnp.zeros((1, d_model), jnp.float32),
        "wv": lin(keys[2], d_model, d_model), "bv": jnp.zeros((1, d_model), jnp.float32),
        "wo": lin(keys[3], d_model, d_model), "bo": jnp.zeros((1, d_model), jnp.float32),
        "ln2_g": jnp.ones((1, d_model), jnp.float32),
        "ln2_b": jnp.zeros((1, d_model), jnp.float32),
        "w1": lin(keys[4], d_model, d_ff), "b1": jnp.zeros((1, d_ff), jnp.float32),
        "w2": lin(keys[5], d_ff, d_model), "b2": jnp.zeros((1, d_model), jnp.float32),
    }


def ref_encoder_block(x, params, num_head):
    # Pure-JAX f32 reference mirroring the PyTorch module (inference mode).
    def ln(v, g, b):
        mu = v.mean(-1, keepdims=True)
        var = ((v - mu) ** 2).mean(-1, keepdims=True)
        return (v - mu) / jnp.sqrt(var + 1e-5) * g + b

    B, S, D = x.shape
    dh = D // num_head
    xn = ln(x, params["ln1_g"], params["ln1_b"])
    q = xn @ params["wq"] + params["bq"]
    k = xn @ params["wk"] + params["bk"]
    v = xn @ params["wv"] + params["bv"]

    def split(t):
        return t.reshape(B, S, num_head, dh).transpose(0, 2, 1, 3)

    qh, kh, vh = split(q), split(k), split(v)
    s = jnp.einsum("bhqd,bhkd->bhqk", qh, kh) / math.sqrt(dh)
    p = jax.nn.softmax(s, axis=-1)
    ctx = jnp.einsum("bhqk,bhkd->bhqd", p, vh)
    ctx = ctx.transpose(0, 2, 1, 3).reshape(B, S, D)
    h1 = x + ctx @ params["wo"] + params["bo"]
    hn = ln(h1, params["ln2_g"], params["ln2_b"])
    f = jax.nn.gelu(hn @ params["w1"] + params["b1"], approximate=False)
    f = f @ params["w2"] + params["b2"]
    return h1 + f


if __name__ == "__main__":
    B, S, D, H, D_FF = 2, 8, 32, 4, 64

    key = jax.random.PRNGKey(0)
    k_x, k_p = jax.random.split(key)
    x = jax.random.normal(k_x, (B, S, D), jnp.float32)
    params = init_params(k_p, D, D_FF)

    out = encoder_block(x, params, num_head=H)
    jax.block_until_ready(out)
    assert out.shape == (B, S, D) and out.dtype == jnp.float32

    ref = ref_encoder_block(x, params, H)
    err = float(jnp.max(jnp.abs(out - ref)))
    assert err < 5e-2, f"max abs error {err}"  # bf16 MXU operands / approx reciprocal
    print("KERNEL_OK")
</pallas_src>

<mosaic_0001>
module attributes {stable_mosaic.version = 11 : i64} {
  func.func @encoder_block_kernel(%arg0: i32, %arg1: i32, %arg2: memref<1x8x32xf32, #tpu.memory_space<vmem>>, %arg3: memref<1x32xf32, #tpu.memory_space<vmem>>, %arg4: memref<1x32xf32, #tpu.memory_space<vmem>>, %arg5: memref<4x32x8xbf16, #tpu.memory_space<vmem>>, %arg6: memref<4x1x8xf32, #tpu.memory_space<vmem>>, %arg7: memref<4x32x8xbf16, #tpu.memory_space<vmem>>, %arg8: memref<4x1x8xf32, #tpu.memory_space<vmem>>, %arg9: memref<4x32x8xbf16, #tpu.memory_space<vmem>>, %arg10: memref<4x1x8xf32, #tpu.memory_space<vmem>>, %arg11: memref<4x8x32xbf16, #tpu.memory_space<vmem>>, %arg12: memref<1x32xf32, #tpu.memory_space<vmem>>, %arg13: memref<1x32xf32, #tpu.memory_space<vmem>>, %arg14: memref<1x32xf32, #tpu.memory_space<vmem>>, %arg15: memref<32x64xbf16, #tpu.memory_space<vmem>>, %arg16: memref<1x64xf32, #tpu.memory_space<vmem>>, %arg17: memref<64x32xbf16, #tpu.memory_space<vmem>>, %arg18: memref<1x32xf32, #tpu.memory_space<vmem>>, %arg19: memref<1x8x32xf32, #tpu.memory_space<vmem>>, %arg20: memref<4x8x8xbf16, #tpu.memory_space<vmem>>, %arg21: memref<4x8x8xbf16, #tpu.memory_space<vmem>>, %arg22: memref<8x32xbf16, #tpu.memory_space<vmem>>) attributes {dimension_semantics = [#tpu.dimension_semantics<parallel>, #tpu.dimension_semantics<arbitrary>], iteration_bounds = array<i64: 2, 1>, scalar_prefetch = 0 : i64, scratch_operands = 3 : i64, tpu.core_type = #tpu.core_type<tc>, window_params = [{transform_indices = @transform_0, window_bounds = array<i64: 1, 8, 32>}, {pipeline_mode = #tpu.pipeline_mode<synchronous>, transform_indices = @transform_1, window_bounds = array<i64: 1, 32>}, {pipeline_mode = #tpu.pipeline_mode<synchronous>, transform_indices = @transform_2, window_bounds = array<i64: 1, 32>}, {pipeline_mode = #tpu.pipeline_mode<synchronous>, transform_indices = @transform_3, window_bounds = array<i64: 4, 32, 8>}, {pipeline_mode = #tpu.pipeline_mode<synchronous>, transform_indices = @transform_4, window_bounds = array<i64: 4, 1, 8>}, {pipeline_mode = #tpu.pipeline_mode<synchronous>, transform_indices = @transform_5, window_bounds = array<i64: 4, 32, 8>}, {pipeline_mode = #tpu.pipeline_mode<synchronous>, transform_indices = @transform_6, window_bounds = array<i64: 4, 1, 8>}, {pipeline_mode = #tpu.pipeline_mode<synchronous>, transform_indices = @transform_7, window_bounds = array<i64: 4, 32, 8>}, {pipeline_mode = #tpu.pipeline_mode<synchronous>, transform_indices = @transform_8, window_bounds = array<i64: 4, 1, 8>}, {pipeline_mode = #tpu.pipeline_mode<synchronous>, transform_indices = @transform_9, window_bounds = array<i64: 4, 8, 32>}, {pipeline_mode = #tpu.pipeline_mode<synchronous>, transform_indices = @transform_10, window_bounds = array<i64: 1, 32>}, {pipeline_mode = #tpu.pipeline_mode<synchronous>, transform_indices = @transform_11, window_bounds = array<i64: 1, 32>}, {pipeline_mode = #tpu.pipeline_mode<synchronous>, transform_indices = @transform_12, window_bounds = array<i64: 1, 32>}, {pipeline_mode = #tpu.pipeline_mode<synchronous>, transform_indices = @transform_13, window_bounds = array<i64: 32, 64>}, {pipeline_mode = #tpu.pipeline_mode<synchronous>, transform_indices = @transform_14, window_bounds = array<i64: 1, 64>}, {pipeline_mode = #tpu.pipeline_mode<synchronous>, transform_indices = @transform_15, window_bounds = array<i64: 64, 32>}, {pipeline_mode = #tpu.pipeline_mode<synchronous>, transform_indices = @transform_16, window_bounds = array<i64: 1, 32>}, {transform_indices = @transform_17, window_bounds = array<i64: 1, 8, 32>}]} {
    %c0_i32 = arith.constant 0 : i32
    %0 = arith.cmpi eq, %arg1, %c0_i32 : i32
    %1 = arith.extui %0 : i1 to i32
    %c0_i32_0 = arith.constant 0 : i32
    %2 = arith.cmpi ne, %1, %c0_i32_0 : i32
    scf.if %2 {
      %c0_51 = arith.constant 0 : index
      %c0_52 = arith.constant 0 : index
      %c0_53 = arith.constant 0 : index
      %90 = vector.load %arg2[%c0_51, %c0_52, %c0_53] : memref<1x8x32xf32, #tpu.memory_space<vmem>>, vector<1x8x32xf32>
      %91 = vector.shape_cast %90 : vector<1x8x32xf32> to vector<8x32xf32>
      %c0_54 = arith.constant 0 : index
      %c0_55 = arith.constant 0 : index
      %92 = vector.load %arg3[%c0_54, %c0_55] : memref<1x32xf32, #tpu.memory_space<vmem>>, vector<1x32xf32>
      %c0_56 = arith.constant 0 : index
      %c0_57 = arith.constant 0 : index
      %93 = vector.load %arg4[%c0_56, %c0_57] : memref<1x32xf32, #tpu.memory_space<vmem>>, vector<1x32xf32>
      %cst_58 = arith.constant dense<0.000000e+00> : vector<8xf32>
      %94 = vector.multi_reduction <add>, %91, %cst_58 [1] : vector<8x32xf32> to vector<8xf32>
      %95 = vector.shape_cast %94 : vector<8xf32> to vector<8x1xf32>
      %cst_59 = arith.constant 3.200000e+01 : f32
      %96 = vector.broadcast %cst_59 : f32 to vector<8x1xf32>
      %97 = arith.divf %95, %96 : vector<8x1xf32>
      %98 = vector.broadcast %97 : vector<8x1xf32> to vector<8x32xf32>
      %99 = arith.subf %91, %98 : vector<8x32xf32>
      %100 = arith.mulf %99, %99 : vector<8x32xf32>
      %cst_60 = arith.constant dense<0.000000e+00> : vector<8xf32>
      %101 = vector.multi_reduction <add>, %100, %cst_60 [1] : vector<8x32xf32> to vector<8xf32>
      %102 = vector.shape_cast %101 : vector<8xf32> to vector<8x1xf32>
      %cst_61 = arith.constant 3.200000e+01 : f32
      %103 = vector.broadcast %cst_61 : f32 to vector<8x1xf32>
      %104 = arith.divf %102, %103 : vector<8x1xf32>
      %105 = vector.broadcast %97 : vector<8x1xf32> to vector<8x32xf32>
      %106 = arith.subf %91, %105 : vector<8x32xf32>
      %cst_62 = arith.constant 9.99999974E-6 : f32
      %107 = vector.broadcast %cst_62 : f32 to vector<8x1xf32>
      %108 = arith.addf %104, %107 : vector<8x1xf32>
      %109 = math.rsqrt %108 : vector<8x1xf32>
      %110 = vector.broadcast %109 : vector<8x1xf32> to vector<8x32xf32>
      %111 = arith.mulf %106, %110 : vector<8x32xf32>
      %112 = vector.broadcast %92 : vector<1x32xf32> to vector<8x32xf32>
      %113 = arith.mulf %111, %112 : vector<8x32xf32>
      %114 = vector.broadcast %93 : vector<1x32xf32> to vector<8x32xf32>
      %115 = arith.addf %113, %114 : vector<8x32xf32>
      %116 = arith.truncf %115 : vector<8x32xf32> to vector<8x32xbf16>
      %c0_63 = arith.constant 0 : index
      %c0_64 = arith.constant 0 : index
      %117 = vector.load %arg22[%c0_63, %c0_64] : memref<8x32xbf16, #tpu.memory_space<vmem>>, vector<8x32xbf16>
      tpu.vector_store %arg22[%c0_63, %c0_64], %116 {strides = array<i32>} : memref<8x32xbf16, #tpu.memory_space<vmem>>, vector<8x32xbf16>,
      %c0_65 = arith.constant 0 : index
      %c0_66 = arith.constant 0 : index
      %c0_67 = arith.constant 0 : index
      %118 = vector.load %arg7[%c0_65, %c0_66, %c0_67] : memref<4x32x8xbf16, #tpu.memory_space<vmem>>, vector<1x32x8xbf16>
      %119 = vector.shape_cast %118 : vector<1x32x8xbf16> to vector<32x8xbf16>
      %cst_68 = arith.constant dense<0.000000e+00> : vector<8x8xf32>
      %120 = tpu.matmul %116, %119, %cst_68 {dimension_numbers = #tpu.dot_dimension_numbers<[1], [0], [0], [1], [0, 0, 1, 1], [], []>} : vector<8x32xbf16>, vector<32x8xbf16>, vector<8x8xf32> -> vector<8x8xf32>
      %c0_69 = arith.constant 0 : index
      %c0_70 = arith.constant 0 : index
      %c0_71 = arith.constant 0 : index
      %121 = vector.load %arg8[%c0_69, %c0_70, %c0_71] : memref<4x1x8xf32, #tpu.memory_space<vmem>>, vector<1x1x8xf32>
      %122 = vector.shape_cast %121 : vector<1x1x8xf32> to vector<1x8xf32>
      %123 = vector.broadcast %122 : vector<1x8xf32> to vector<8x8xf32>
      %124 = arith.addf %120, %123 : vector<8x8xf32>
      %c0_72 = arith.constant 0 : index
      %c0_73 = arith.constant 0 : index
      %c0_74 = arith.constant 0 : index
      %125 = vector.load %arg9[%c0_72, %c0_73, %c0_74] : memref<4x32x8xbf16, #tpu.memory_space<vmem>>, vector<1x32x8xbf16>
      %126 = vector.shape_cast %125 : vector<1x32x8xbf16> to vector<32x8xbf16>
      %cst_75 = arith.constant dense<0.000000e+00> : vector<8x8xf32>
      %127 = tpu.matmul %116, %126, %cst_75 {dimension_numbers = #tpu.dot_dimension_numbers<[1], [0], [0], [1], [0, 0, 1, 1], [], []>} : vector<8x32xbf16>, vector<32x8xbf16>, vector<8x8xf32> -> vector<8x8xf32>
      %c0_76 = arith.constant 0 : index
      %c0_77 = arith.constant 0 : index
      %c0_78 = arith.constant 0 : index
      %128 = vector.load %arg10[%c0_76, %c0_77, %c0_78] : memref<4x1x8xf32, #tpu.memory_space<vmem>>, vector<1x1x8xf32>
      %129 = vector.shape_cast %128 : vector<1x1x8xf32> to vector<1x8xf32>
      %130 = vector.broadcast %129 : vector<1x8xf32> to vector<8x8xf32>
      %131 = arith.addf %127, %130 : vector<8x8xf32>
      %132 = arith.truncf %124 : vector<8x8xf32> to vector<8x8xbf16>
      %c0_79 = arith.constant 0 : index
      %c0_80 = arith.constant 0 : index
      %c0_81 = arith.constant 0 : index
      %133 = vector.load %arg20[%c0_79, %c0_80, %c0_81] : memref<4x8x8xbf16, #tpu.memory_space<vmem>>, vector<1x8x8xbf16>
      %134 = vector.shape_cast %133 : vector<1x8x8xbf16> to vector<8x8xbf16>
      %135 = vector.shape_cast %132 : vector<8x8xbf16> to vector<1x8x8xbf16>
      tpu.vector_store %arg20[%c0_79, %c0_80, %c0_81], %135 {strides = array<i32>} : memref<4x8x8xbf16, #tpu.memory_space<vmem>>, vector<1x8x8xbf16>,
      %136 = arith.truncf %131 : vector<8x8xf32> to vector<8x8xbf16>
      %c0_82 = arith.constant 0 : index
      %c0_83 = arith.constant 0 : index
      %c0_84 = arith.constant 0 : index
      %137 = vector.load %arg21[%c0_82, %c0_83, %c0_84] : memref<4x8x8xbf16, #tpu.memory_space<vmem>>, vector<1x8x8xbf16>
      %138 = vector.shape_cast %137 : vector<1x8x8xbf16> to vector<8x8xbf16>
      %139 = vector.shape_cast %136 : vector<8x8xbf16> to vector<1x8x8xbf16>
      tpu.vector_store %arg21[%c0_82, %c0_83, %c0_84], %139 {strides = array<i32>} : memref<4x8x8xbf16, #tpu.memory_space<vmem>>, vector<1x8x8xbf16>,
      %c1 = arith.constant 1 : index
      %c0_85 = arith.constant 0 : index
      %c0_86 = arith.constant 0 : index
      %140 = vector.load %arg7[%c1, %c0_85, %c0_86] : memref<4x32x8xbf16, #tpu.memory_space<vmem>>, vector<1x32x8xbf16>
      %141 = vector.shape_cast %140 : vector<1x32x8xbf16> to vector<32x8xbf16>
      %cst_87 = arith.constant dense<0.000000e+00> : vector<8x8xf32>
      %142 = tpu.matmul %116, %141, %cst_87 {dimension_numbers = #tpu.dot_dimension_numbers<[1], [0], [0], [1], [0, 0, 1, 1], [], []>} : vector<8x32xbf16>, vector<32x8xbf16>, vector<8x8xf32> -> vector<8x8xf32>
      %c1_88 = arith.constant 1 : index
      %c0_89 = arith.constant 0 : index
      %c0_90 = arith.constant 0 : index
      %143 = vector.load %arg8[%c1_88, %c0_89, %c0_90] : memref<4x1x8xf32, #tpu.memory_space<vmem>>, vector<1x1x8xf32>
      %144 = vector.shape_cast %143 : vector<1x1x8xf32> to vector<1x8xf32>
      %145 = vector.broadcast %144 : vector<1x8xf32> to vector<8x8xf32>
      %146 = arith.addf %142, %145 : vector<8x8xf32>
      %c1_91 = arith.constant 1 : index
      %c0_92 = arith.constant 0 : index
      %c0_93 = arith.constant 0 : index
      %147 = vector.load %arg9[%c1_91, %c0_92, %c0_93] : memref<4x32x8xbf16, #tpu.memory_space<vmem>>, vector<1x32x8xbf16>
      %148 = vector.shape_cast %147 : vector<1x32x8xbf16> to vector<32x8xbf16>
      %cst_94 = arith.constant dense<0.000000e+00> : vector<8x8xf32>
      %149 = tpu.matmul %116, %148, %cst_94 {dimension_numbers = #tpu.dot_dimension_numbers<[1], [0], [0], [1], [0, 0, 1, 1], [], []>} : vector<8x32xbf16>, vector<32x8xbf16>, vector<8x8xf32> -> vector<8x8xf32>
      %c1_95 = arith.constant 1 : index
      %c0_96 = arith.constant 0 : index
      %c0_97 = arith.constant 0 : index
      %150 = vector.load %arg10[%c1_95, %c0_96, %c0_97] : memref<4x1x8xf32, #tpu.memory_space<vmem>>, vector<1x1x8xf32>
      %151 = vector.shape_cast %150 : vector<1x1x8xf32> to vector<1x8xf32>
      %152 = vector.broadcast %151 : vector<1x8xf32> to vector<8x8xf32>
      %153 = arith.addf %149, %152 : vector<8x8xf32>
      %154 = arith.truncf %146 : vector<8x8xf32> to vector<8x8xbf16>
      %c1_98 = arith.constant 1 : index
      %c0_99 = arith.constant 0 : index
      %c0_100 = arith.constant 0 : index
      %155 = vector.load %arg20[%c1_98, %c0_99, %c0_100] : memref<4x8x8xbf16, #tpu.memory_space<vmem>>, vector<1x8x8xbf16>
      %156 = vector.shape_cast %155 : vector<1x8x8xbf16> to vector<8x8xbf16>
      %157 = vector.shape_cast %154 : vector<8x8xbf16> to vector<1x8x8xbf16>
      tpu.vector_store %arg20[%c1_98, %c0_99, %c0_100], %157 {strides = array<i32>} : memref<4x8x8xbf16, #tpu.memory_space<vmem>>, vector<1x8x8xbf16>,
      %158 = arith.truncf %153 : vector<8x8xf32> to vector<8x8xbf16>
      %c1_101 = arith.constant 1 : index
      %c0_102 = arith.constant 0 : index
      %c0_103 = arith.constant 0 : index
      %159 = vector.load %arg21[%c1_101, %c0_102, %c0_103] : memref<4x8x8xbf16, #tpu.memory_space<vmem>>, vector<1x8x8xbf16>
      %160 = vector.shape_cast %159 : vector<1x8x8xbf16> to vector<8x8xbf16>
      %161 = vector.shape_cast %158 : vector<8x8xbf16> to vector<1x8x8xbf16>
      tpu.vector_store %arg21[%c1_101, %c0_102, %c0_103], %161 {strides = array<i32>} : memref<4x8x8xbf16, #tpu.memory_space<vmem>>, vector<1x8x8xbf16>,
      %c2 = arith.constant 2 : index
      %c0_104 = arith.constant 0 : index
      %c0_105 = arith.constant 0 : index
      %162 = vector.load %arg7[%c2, %c0_104, %c0_105] : memref<4x32x8xbf16, #tpu.memory_space<vmem>>, vector<1x32x8xbf16>
      %163 = vector.shape_cast %162 : vector<1x32x8xbf16> to vector<32x8xbf16>
      %cst_106 = arith.constant dense<0.000000e+00> : vector<8x8xf32>
      %164 = tpu.matmul %116, %163, %cst_106 {dimension_numbers = #tpu.dot_dimension_numbers<[1], [0], [0], [1], [0, 0, 1, 1], [], []>} : vector<8x32xbf16>, vector<32x8xbf16>, vector<8x8xf32> -> vector<8x8xf32>
      %c2_107 = arith.constant 2 : index
      %c0_108 = arith.constant 0 : index
      %c0_109 = arith.constant 0 : index
      %165 = vector.load %arg8[%c2_107, %c0_108, %c0_109] : memref<4x1x8xf32, #tpu.memory_space<vmem>>, vector<1x1x8xf32>
      %166 = vector.shape_cast %165 : vector<1x1x8xf32> to vector<1x8xf32>
      %167 = vector.broadcast %166 : vector<1x8xf32> to vector<8x8xf32>
      %168 = arith.addf %164, %167 : vector<8x8xf32>
      %c2_110 = arith.constant 2 : index
      %c0_111 = arith.constant 0 : index
      %c0_112 = arith.constant 0 : index
      %169 = vector.load %arg9[%c2_110, %c0_111, %c0_112] : memref<4x32x8xbf16, #tpu.memory_space<vmem>>, vector<1x32x8xbf16>
      %170 = vector.shape_cast %169 : vector<1x32x8xbf16> to vector<32x8xbf16>
      %cst_113 = arith.constant dense<0.000000e+00> : vector<8x8xf32>
      %171 = tpu.matmul %116, %170, %cst_113 {dimension_numbers = #tpu.dot_dimension_numbers<[1], [0], [0], [1], [0, 0, 1, 1], [], []>} : vector<8x32xbf16>, vector<32x8xbf16>, vector<8x8xf32> -> vector<8x8xf32>
      %c2_114 = arith.constant 2 : index
      %c0_115 = arith.constant 0 : index
      %c0_116 = arith.constant 0 : index
      %172 = vector.load %arg10[%c2_114, %c0_115, %c0_116] : memref<4x1x8xf32, #tpu.memory_space<vmem>>, vector<1x1x8xf32>
      %173 = vector.shape_cast %172 : vector<1x1x8xf32> to vector<1x8xf32>
      %174 = vector.broadcast %173 : vector<1x8xf32> to vector<8x8xf32>
      %175 = arith.addf %171, %174 : vector<8x8xf32>
      %176 = arith.truncf %168 : vector<8x8xf32> to vector<8x8xbf16>
      %c2_117 = arith.constant 2 : index
      %c0_118 = arith.constant 0 : index
      %c0_119 = arith.constant 0 : index
      %177 = vector.load %arg20[%c2_117, %c0_118, %c0_119] : memref<4x8x8xbf16, #tpu.memory_space<vmem>>, vector<1x8x8xbf16>
      %178 = vector.shape_cast %177 : vector<1x8x8xbf16> to vector<8x8xbf16>
      %179 = vector.shape_cast %176 : vector<8x8xbf16> to vector<1x8x8xbf16>
      tpu.vector_store %arg20[%c2_117, %c0_118, %c0_119], %179 {strides = array<i32>} : memref<4x8x8xbf16, #tpu.memory_space<vmem>>, vector<1x8x8xbf16>,
      %180 = arith.truncf %175 : vector<8x8xf32> to vector<8x8xbf16>
      %c2_120 = arith.constant 2 : index
      %c0_121 = arith.constant 0 : index
      %c0_122 = arith.constant 0 : index
      %181 = vector.load %arg21[%c2_120, %c0_121, %c0_122] : memref<4x8x8xbf16, #tpu.memory_space<vmem>>, vector<1x8x8xbf16>
      %182 = vector.shape_cast %181 : vector<1x8x8xbf16> to vector<8x8xbf16>
      %183 = vector.shape_cast %180 : vector<8x8xbf16> to vector<1x8x8xbf16>
      tpu.vector_store %arg21[%c2_120, %c0_121, %c0_122], %183 {strides = array<i32>} : memref<4x8x8xbf16, #tpu.memory_space<vmem>>, vector<1x8x8xbf16>,
      %c3 = arith.constant 3 : index
      %c0_123 = arith.constant 0 : index
      %c0_124 = arith.constant 0 : index
      %184 = vector.load %arg7[%c3, %c0_123, %c0_124] : memref<4x32x8xbf16, #tpu.memory_space<vmem>>, vector<1x32x8xbf16>
      %185 = vector.shape_cast %184 : vector<1x32x8xbf16> to vector<32x8xbf16>
      %cst_125 = arith.constant dense<0.000000e+00> : vector<8x8xf32>
      %186 = tpu.matmul %116, %185, %cst_125 {dimension_numbers = #tpu.dot_dimension_numbers<[1], [0], [0], [1], [0, 0, 1, 1], [], []>} : vector<8x32xbf16>, vector<32x8xbf16>, vector<8x8xf32> -> vector<8x8xf32>
      %c3_126 = arith.constant 3 : index
      %c0_127 = arith.constant 0 : index
      %c0_128 = arith.constant 0 : index
      %187 = vector.load %arg8[%c3_126, %c0_127, %c0_128] : memref<4x1x8xf32, #tpu.memory_space<vmem>>, vector<1x1x8xf32>
      %188 = vector.shape_cast %187 : vector<1x1x8xf32> to vector<1x8xf32>
      %189 = vector.broadcast %188 : vector<1x8xf32> to vector<8x8xf32>
      %190 = arith.addf %186, %189 : vector<8x8xf32>
      %c3_129 = arith.constant 3 : index
      %c0_130 = arith.constant 0 : index
      %c0_131 = arith.constant 0 : index
      %191 = vector.load %arg9[%c3_129, %c0_130, %c0_131] : memref<4x32x8xbf16, #tpu.memory_space<vmem>>, vector<1x32x8xbf16>
      %192 = vector.shape_cast %191 : vector<1x32x8xbf16> to vector<32x8xbf16>
      %cst_132 = arith.constant dense<0.000000e+00> : vector<8x8xf32>
      %193 = tpu.matmul %116, %192, %cst_132 {dimension_numbers = #tpu.dot_dimension_numbers<[1], [0], [0], [1], [0, 0, 1, 1], [], []>} : vector<8x32xbf16>, vector<32x8xbf16>, vector<8x8xf32> -> vector<8x8xf32>
      %c3_133 = arith.constant 3 : index
      %c0_134 = arith.constant 0 : index
      %c0_135 = arith.constant 0 : index
      %194 = vector.load %arg10[%c3_133, %c0_134, %c0_135] : memref<4x1x8xf32, #tpu.memory_space<vmem>>, vector<1x1x8xf32>
      %195 = vector.shape_cast %194 : vector<1x1x8xf32> to vector<1x8xf32>
      %196 = vector.broadcast %195 : vector<1x8xf32> to vector<8x8xf32>
      %197 = arith.addf %193, %196 : vector<8x8xf32>
      %198 = arith.truncf %190 : vector<8x8xf32> to vector<8x8xbf16>
      %c3_136 = arith.constant 3 : index
      %c0_137 = arith.constant 0 : index
      %c0_138 = arith.constant 0 : index
      %199 = vector.load %arg20[%c3_136, %c0_137, %c0_138] : memref<4x8x8xbf16, #tpu.memory_space<vmem>>, vector<1x8x8xbf16>
      %200 = vector.shape_cast %199 : vector<1x8x8xbf16> to vector<8x8xbf16>
      %201 = vector.shape_cast %198 : vector<8x8xbf16> to vector<1x8x8xbf16>
      tpu.vector_store %arg20[%c3_136, %c0_137, %c0_138], %201 {strides = array<i32>} : memref<4x8x8xbf16, #tpu.memory_space<vmem>>, vector<1x8x8xbf16>,
      %202 = arith.truncf %197 : vector<8x8xf32> to vector<8x8xbf16>
      %c3_139 = arith.constant 3 : index
      %c0_140 = arith.constant 0 : index
      %c0_141 = arith.constant 0 : index
      %203 = vector.load %arg21[%c3_139, %c0_140, %c0_141] : memref<4x8x8xbf16, #tpu.memory_space<vmem>>, vector<1x8x8xbf16>
      %204 = vector.shape_cast %203 : vector<1x8x8xbf16> to vector<8x8xbf16>
      %205 = vector.shape_cast %202 : vector<8x8xbf16> to vector<1x8x8xbf16>
      tpu.vector_store %arg21[%c3_139, %c0_140, %c0_141], %205 {strides = array<i32>} : memref<4x8x8xbf16, #tpu.memory_space<vmem>>, vector<1x8x8xbf16>,
    } else {
    }
    %c8_i32 = arith.constant 8 : i32
    %3 = arith.muli %arg1, %c8_i32 : i32
    %4 = tpu.assume_multiple %3, 8 : i32
    %c0 = arith.constant 0 : index
    %5 = arith.index_cast %4 : i32 to index
    %c0_1 = arith.constant 0 : index
    %6 = vector.load %arg2[%c0, %5, %c0_1] : memref<1x8x32xf32, #tpu.memory_space<vmem>>, vector<1x8x32xf32>
    %7 = vector.shape_cast %6 : vector<1x8x32xf32> to vector<8x32xf32>
    %8 = arith.index_cast %4 : i32 to index
    %c0_2 = arith.constant 0 : index
    %9 = vector.load %arg22[%8, %c0_2] : memref<8x32xbf16, #tpu.memory_space<vmem>>, vector<8x32xbf16>
    %10 = vector.shape_cast %9 : vector<8x32xbf16> to vector<1x8x32xbf16>
    %11 = vector.shape_cast %10 : vector<1x8x32xbf16> to vector<1x8x32xbf16>
    %12 = vector.broadcast %11 : vector<1x8x32xbf16> to vector<4x8x32xbf16>
    %c0_3 = arith.constant 0 : index
    %c0_4 = arith.constant 0 : index
    %c0_5 = arith.constant 0 : index
    %13 = vector.load %arg5[%c0_3, %c0_4, %c0_5] : memref<4x32x8xbf16, #tpu.memory_space<vmem>>, vector<4x32x8xbf16>
    "tpu.trace_start"() <{level = 10 : i32, message = "hqd,hde->hqe"}> : () -> ()
    %cst = arith.constant dense<0.000000e+00> : vector<4x8x8xf32>
    %14 = tpu.matmul %12, %13, %cst {dimension_numbers = #tpu.dot_dimension_numbers<[2], [1], [1], [2], [0, 0, 0, 1, 1, 2], [0], [0]>} : vector<4x8x32xbf16>, vector<4x32x8xbf16>, vector<4x8x8xf32> -> vector<4x8x8xf32>
    "tpu.trace_stop"() : () -> ()
    %c0_6 = arith.constant 0 : index
    %c0_7 = arith.constant 0 : index
    %c0_8 = arith.constant 0 : index
    %15 = vector.load %arg6[%c0_6, %c0_7, %c0_8] : memref<4x1x8xf32, #tpu.memory_space<vmem>>, vector<4x1x8xf32>
    %16 = vector.broadcast %15 : vector<4x1x8xf32> to vector<4x8x8xf32>
    %17 = arith.addf %14, %16 : vector<4x8x8xf32>
    %18 = arith.truncf %17 : vector<4x8x8xf32> to vector<4x8x8xbf16>
    %c0_9 = arith.constant 0 : index
    %c0_10 = arith.constant 0 : index
    %c0_11 = arith.constant 0 : index
    %19 = vector.load %arg20[%c0_9, %c0_10, %c0_11] : memref<4x8x8xbf16, #tpu.memory_space<vmem>>, vector<4x8x8xbf16>
    %c0_12 = arith.constant 0 : index
    %c0_13 = arith.constant 0 : index
    %c0_14 = arith.constant 0 : index
    %20 = vector.load %arg21[%c0_12, %c0_13, %c0_14] : memref<4x8x8xbf16, #tpu.memory_space<vmem>>, vector<4x8x8xbf16>
    "tpu.trace_start"() <{level = 10 : i32, message = "hqd,hkd->hqk"}> : () -> ()
    %cst_15 = arith.constant dense<0.000000e+00> : vector<4x8x8xf32>
    %21 = tpu.matmul %18, %19, %cst_15 {dimension_numbers = #tpu.dot_dimension_numbers<[2], [2], [1], [1], [0, 0, 0, 1, 1, 1], [0], [0]>} : vector<4x8x8xbf16>, vector<4x8x8xbf16>, vector<4x8x8xf32> -> vector<4x8x8xf32>
    "tpu.trace_stop"() : () -> ()
    %cst_16 = arith.constant dense<0xFF800000> : vector<4x8xf32>
    %22 = vector.multi_reduction <maximumf>, %21, %cst_16 [2] : vector<4x8x8xf32> to vector<4x8xf32>
    %23 = vector.shape_cast %22 : vector<4x8xf32> to vector<4x8x1xf32>
    %24 = vector.broadcast %23 : vector<4x8x1xf32> to vector<4x8x8xf32>
    %25 = arith.subf %21, %24 : vector<4x8x8xf32>
    %26 = math.exp %25 : vector<4x8x8xf32>
    %cst_17 = arith.constant dense<0.000000e+00> : vector<4x8xf32>
    %27 = vector.multi_reduction <add>, %26, %cst_17 [2] : vector<4x8x8xf32> to vector<4x8xf32>
    %28 = vector.shape_cast %27 : vector<4x8xf32> to vector<4x8x1xf32>
    %29 = arith.truncf %26 : vector<4x8x8xf32> to vector<4x8x8xbf16>
    "tpu.trace_start"() <{level = 10 : i32, message = "hqk,hkd->hqd"}> : () -> ()
    %cst_18 = arith.constant dense<0.000000e+00> : vector<4x8x8xf32>
    %30 = tpu.matmul %29, %20, %cst_18 {dimension_numbers = #tpu.dot_dimension_numbers<[2], [1], [1], [2], [0, 0, 0, 1, 1, 2], [0], [0]>} : vector<4x8x8xbf16>, vector<4x8x8xbf16>, vector<4x8x8xf32> -> vector<4x8x8xf32>
    "tpu.trace_stop"() : () -> ()
    %31 = tpu.reciprocal %28 {approx = true} : vector<4x8x1xf32> -> vector<4x8x1xf32>
    %32 = vector.broadcast %31 : vector<4x8x1xf32> to vector<4x8x8xf32>
    %33 = arith.mulf %30, %32 : vector<4x8x8xf32>
    %34 = arith.truncf %33 : vector<4x8x8xf32> to vector<4x8x8xbf16>
    %c0_19 = arith.constant 0 : index
    %c0_20 = arith.constant 0 : index
    %c0_21 = arith.constant 0 : index
    %35 = vector.load %arg11[%c0_19, %c0_20, %c0_21] : memref<4x8x32xbf16, #tpu.memory_space<vmem>>, vector<4x8x32xbf16>
    "tpu.trace_start"() <{level = 10 : i32, message = "hqd,hde->hqe"}> : () -> ()
    %cst_22 = arith.constant dense<0.000000e+00> : vector<4x8x32xf32>
    %36 = tpu.matmul %34, %35, %cst_22 {dimension_numbers = #tpu.dot_dimension_numbers<[2], [1], [1], [2], [0, 0, 0, 1, 1, 2], [0], [0]>} : vector<4x8x8xbf16>, vector<4x8x32xbf16>, vector<4x8x32xf32> -> vector<4x8x32xf32>
    "tpu.trace_stop"() : () -> ()
    %cst_23 = arith.constant dense<0.000000e+00> : vector<8x32xf32>
    %37 = vector.multi_reduction <add>, %36, %cst_23 [0] : vector<4x8x32xf32> to vector<8x32xf32>
    %c0_24 = arith.constant 0 : index
    %c0_25 = arith.constant 0 : index
    %38 = vector.load %arg12[%c0_24, %c0_25] : memref<1x32xf32, #tpu.memory_space<vmem>>, vector<1x32xf32>
    %39 = vector.broadcast %38 : vector<1x32xf32> to vector<8x32xf32>
    %40 = arith.addf %37, %39 : vector<8x32xf32>
    %41 = arith.addf %7, %40 : vector<8x32xf32>
    %c0_26 = arith.constant 0 : index
    %c0_27 = arith.constant 0 : index
    %42 = vector.load %arg13[%c0_26, %c0_27] : memref<1x32xf32, #tpu.memory_space<vmem>>, vector<1x32xf32>
    %c0_28 = arith.constant 0 : index
    %c0_29 = arith.constant 0 : index
    %43 = vector.load %arg14[%c0_28, %c0_29] : memref<1x32xf32, #tpu.memory_space<vmem>>, vector<1x32xf32>
    %cst_30 = arith.constant dense<0.000000e+00> : vector<8xf32>
    %44 = vector.multi_reduction <add>, %41, %cst_30 [1] : vector<8x32xf32> to vector<8xf32>
    %45 = vector.shape_cast %44 : vector<8xf32> to vector<8x1xf32>
    %cst_31 = arith.constant 3.200000e+01 : f32
    %46 = vector.broadcast %cst_31 : f32 to vector<8x1xf32>
    %47 = arith.divf %45, %46 : vector<8x1xf32>
    %48 = vector.broadcast %47 : vector<8x1xf32> to vector<8x32xf32>
    %49 = arith.subf %41, %48 : vector<8x32xf32>
    %50 = arith.mulf %49, %49 : vector<8x32xf32>
    %cst_32 = arith.constant dense<0.000000e+00> : vector<8xf32>
    %51 = vector.multi_reduction <add>, %50, %cst_32 [1] : vector<8x32xf32> to vector<8xf32>
    %52 = vector.shape_cast %51 : vector<8xf32> to vector<8x1xf32>
    %cst_33 = arith.constant 3.200000e+01 : f32
    %53 = vector.broadcast %cst_33 : f32 to vector<8x1xf32>
    %54 = arith.divf %52, %53 : vector<8x1xf32>
    %55 = vector.broadcast %47 : vector<8x1xf32> to vector<8x32xf32>
    %56 = arith.subf %41, %55 : vector<8x32xf32>
    %cst_34 = arith.constant 9.99999974E-6 : f32
    %57 = vector.broadcast %cst_34 : f32 to vector<8x1xf32>
    %58 = arith.addf %54, %57 : vector<8x1xf32>
    %59 = math.rsqrt %58 : vector<8x1xf32>
    %60 = vector.broadcast %59 : vector<8x1xf32> to vector<8x32xf32>
    %61 = arith.mulf %56, %60 : vector<8x32xf32>
    %62 = vector.broadcast %42 : vector<1x32xf32> to vector<8x32xf32>
    %63 = arith.mulf %61, %62 : vector<8x32xf32>
    %64 = vector.broadcast %43 : vector<1x32xf32> to vector<8x32xf32>
    %65 = arith.addf %63, %64 : vector<8x32xf32>
    %66 = arith.truncf %65 : vector<8x32xf32> to vector<8x32xbf16>
    %c0_35 = arith.constant 0 : index
    %c0_36 = arith.constant 0 : index
    %67 = vector.load %arg15[%c0_35, %c0_36] : memref<32x64xbf16, #tpu.memory_space<vmem>>, vector<32x64xbf16>
    %cst_37 = arith.constant dense<0.000000e+00> : vector<8x64xf32>
    %68 = tpu.matmul %66, %67, %cst_37 {dimension_numbers = #tpu.dot_dimension_numbers<[1], [0], [0], [1], [0, 0, 1, 1], [], []>} : vector<8x32xbf16>, vector<32x64xbf16>, vector<8x64xf32> -> vector<8x64xf32>
    %c0_38 = arith.constant 0 : index
    %c0_39 = arith.constant 0 : index
    %69 = vector.load %arg16[%c0_38, %c0_39] : memref<1x64xf32, #tpu.memory_space<vmem>>, vector<1x64xf32>
    %70 = vector.broadcast %69 : vector<1x64xf32> to vector<8x64xf32>
    %71 = arith.addf %68, %70 : vector<8x64xf32>
    %cst_40 = arith.constant 5.000000e-01 : f32
    %72 = vector.broadcast %cst_40 : f32 to vector<8x64xf32>
    %73 = arith.mulf %72, %71 : vector<8x64xf32>
    %cst_41 = arith.constant 0.707106769 : f32
    %74 = vector.broadcast %cst_41 : f32 to vector<8x64xf32>
    %75 = arith.mulf %71, %74 : vector<8x64xf32>
    %76 = math.erf %75 : vector<8x64xf32>
    %cst_42 = arith.constant 1.000000e+00 : f32
    %77 = vector.broadcast %cst_42 : f32 to vector<8x64xf32>
    %78 = arith.addf %77, %76 : vector<8x64xf32>
    %79 = arith.mulf %73, %78 : vector<8x64xf32>
    %80 = arith.truncf %79 : vector<8x64xf32> to vector<8x64xbf16>
    %c0_43 = arith.constant 0 : index
    %c0_44 = arith.constant 0 : index
    %81 = vector.load %arg17[%c0_43, %c0_44] : memref<64x32xbf16, #tpu.memory_space<vmem>>, vector<64x32xbf16>
    %cst_45 = arith.constant dense<0.000000e+00> : vector<8x32xf32>
    %82 = tpu.matmul %80, %81, %cst_45 {dimension_numbers = #tpu.dot_dimension_numbers<[1], [0], [0], [1], [0, 0, 1, 1], [], []>} : vector<8x64xbf16>, vector<64x32xbf16>, vector<8x32xf32> -> vector<8x32xf32>
    %c0_46 = arith.constant 0 : index
    %c0_47 = arith.constant 0 : index
    %83 = vector.load %arg18[%c0_46, %c0_47] : memref<1x32xf32, #tpu.memory_space<vmem>>, vector<1x32xf32>
    %84 = vector.broadcast %83 : vector<1x32xf32> to vector<8x32xf32>
    %85 = arith.addf %82, %84 : vector<8x32xf32>
    %86 = arith.addf %41, %85 : vector<8x32xf32>
    %c0_48 = arith.constant 0 : index
    %c0_49 = arith.constant 0 : index
    %c0_50 = arith.constant 0 : index
    %87 = vector.load %arg19[%c0_48, %c0_49, %c0_50] : memref<1x8x32xf32, #tpu.memory_space<vmem>>, vector<1x8x32xf32>
    %88 = vector.shape_cast %87 : vector<1x8x32xf32> to vector<8x32xf32>
    %89 = vector.shape_cast %86 : vector<8x32xf32> to vector<1x8x32xf32>
    tpu.vector_store %arg19[%c0_48, %c0_49, %c0_50], %89 {strides = array<i32>} : memref<1x8x32xf32, #tpu.memory_space<vmem>>, vector<1x8x32xf32>,
    return
  }
  func.func @transform_0(%arg0: i32, %arg1: i32) -> (i32, i32, i32) {
    %c0_i32 = arith.constant 0 : i32
    %c0_i32_0 = arith.constant 0 : i32
    %c0_i32_1 = arith.constant 0 : i32
    return %arg0, %c0_i32, %c0_i32_0 : i32, i32, i32
  }
  func.func @transform_1(%arg0: i32, %arg1: i32) -> (i32, i32) {
    %c0_i32 = arith.constant 0 : i32
    %c0_i32_0 = arith.constant 0 : i32
    %c0_i32_1 = arith.constant 0 : i32
    return %c0_i32, %c0_i32_0 : i32, i32
  }
  func.func @transform_2(%arg0: i32, %arg1: i32) -> (i32, i32) {
    %c0_i32 = arith.constant 0 : i32
    %c0_i32_0 = arith.constant 0 : i32
    %c0_i32_1 = arith.constant 0 : i32
    return %c0_i32, %c0_i32_0 : i32, i32
  }
  func.func @transform_3(%arg0: i32, %arg1: i32) -> (i32, i32, i32) {
    %c0_i32 = arith.constant 0 : i32
    %c0_i32_0 = arith.constant 0 : i32
    %c0_i32_1 = arith.constant 0 : i32
    %c0_i32_2 = arith.constant 0 : i32
    return %c0_i32, %c0_i32_0, %c0_i32_1 : i32, i32, i32
  }
  func.func @transform_4(%arg0: i32, %arg1: i32) -> (i32, i32, i32) {
    %c0_i32 = arith.constant 0 : i32
    %c0_i32_0 = arith.constant 0 : i32
    %c0_i32_1 = arith.constant 0 : i32
    %c0_i32_2 = arith.constant 0 : i32
    return %c0_i32, %c0_i32_0, %c0_i32_1 : i32, i32, i32
  }
  func.func @transform_5(%arg0: i32, %arg1: i32) -> (i32, i32, i32) {
    %c0_i32 = arith.constant 0 : i32
    %c0_i32_0 = arith.constant 0 : i32
    %c0_i32_1 = arith.constant 0 : i32
    %c0_i32_2 = arith.constant 0 : i32
    return %c0_i32, %c0_i32_0, %c0_i32_1 : i32, i32, i32
  }
  func.func @transform_6(%arg0: i32, %arg1: i32) -> (i32, i32, i32) {
    %c0_i32 = arith.constant 0 : i32
    %c0_i32_0 = arith.constant 0 : i32
    %c0_i32_1 = arith.constant 0 : i32
    %c0_i32_2 = arith.constant 0 : i32
    return %c0_i32, %c0_i32_0, %c0_i32_1 : i32, i32, i32
  }
  func.func @transform_7(%arg0: i32, %arg1: i32) -> (i32, i32, i32) {
    %c0_i32 = arith.constant 0 : i32
    %c0_i32_0 = arith.constant 0 : i32
    %c0_i32_1 = arith.constant 0 : i32
    %c0_i32_2 = arith.constant 0 : i32
    return %c0_i32, %c0_i32_0, %c0_i32_1 : i32, i32, i32
  }
  func.func @transform_8(%arg0: i32, %arg1: i32) -> (i32, i32, i32) {
    %c0_i32 = arith.constant 0 : i32
    %c0_i32_0 = arith.constant 0 : i32
    %c0_i32_1 = arith.constant 0 : i32
    %c0_i32_2 = arith.constant 0 : i32
    return %c0_i32, %c0_i32_0, %c0_i32_1 : i32, i32, i32
  }
  func.func @transform_9(%arg0: i32, %arg1: i32) -> (i32, i32, i32) {
    %c0_i32 = arith.constant 0 : i32
    %c0_i32_0 = arith.constant 0 : i32
    %c0_i32_1 = arith.constant 0 : i32
    %c0_i32_2 = arith.constant 0 : i32
    return %c0_i32, %c0_i32_0, %c0_i32_1 : i32, i32, i32
  }
  func.func @transform_10(%arg0: i32, %arg1: i32) -> (i32, i32) {
    %c0_i32 = arith.constant 0 : i32
    %c0_i32_0 = arith.constant 0 : i32
    %c0_i32_1 = arith.constant 0 : i32
    return %c0_i32, %c0_i32_0 : i32, i32
  }
  func.func @transform_11(%arg0: i32, %arg1: i32) -> (i32, i32) {
    %c0_i32 = arith.constant 0 : i32
    %c0_i32_0 = arith.constant 0 : i32
    %c0_i32_1 = arith.constant 0 : i32
    return %c0_i32, %c0_i32_0 : i32, i32
  }
  func.func @transform_12(%arg0: i32, %arg1: i32) -> (i32, i32) {
    %c0_i32 = arith.constant 0 : i32
    %c0_i32_0 = arith.constant 0 : i32
    %c0_i32_1 = arith.constant 0 : i32
    return %c0_i32, %c0_i32_0 : i32, i32
  }
  func.func @transform_13(%arg0: i32, %arg1: i32) -> (i32, i32) {
    %c0_i32 = arith.constant 0 : i32
    %c0_i32_0 = arith.constant 0 : i32
    %c0_i32_1 = arith.constant 0 : i32
    return %c0_i32, %c0_i32_0 : i32, i32
  }
  func.func @transform_14(%arg0: i32, %arg1: i32) -> (i32, i32) {
    %c0_i32 = arith.constant 0 : i32
    %c0_i32_0 = arith.constant 0 : i32
    %c0_i32_1 = arith.constant 0 : i32
    return %c0_i32, %c0_i32_0 : i32, i32
  }
  func.func @transform_15(%arg0: i32, %arg1: i32) -> (i32, i32) {
    %c0_i32 = arith.constant 0 : i32
    %c0_i32_0 = arith.constant 0 : i32
    %c0_i32_1 = arith.constant 0 : i32
    return %c0_i32, %c0_i32_0 : i32, i32
  }
  func.func @transform_16(%arg0: i32, %arg1: i32) -> (i32, i32) {
    %c0_i32 = arith.constant 0 : i32
    %c0_i32_0 = arith.constant 0 : i32
    %c0_i32_1 = arith.constant 0 : i32
    return %c0_i32, %c0_i32_0 : i32, i32
  }
  func.func @transform_17(%arg0: i32, %arg1: i32) -> (i32, i32, i32) {
    %c0_i32 = arith.constant 0 : i32
    %c0_i32_0 = arith.constant 0 : i32
    return %arg0, %arg1, %c0_i32 : i32, i32, i32
  }
}

</mosaic_0001>

<bundles_post_ra>
// kernel: tpu_custom_call.1
= control target key start
LH: loop header
LB: loop body
LE: loop exit
PB: predicated region body
PF: predicated region fallthrough
CT: control target
= control target key end

     0   :  { %s2451_s0 = inlined_call_operand.vmem [shape: f32[2,8,32], index: 0, kind: input, shape index: {}]   ;;  %s2452_s1 = inlined_call_operand.vmem [shape: f32[1,32], index: 1, kind: input, shape index: {}]   ;;  %s2453_s2 = inlined_call_operand.vmem [shape: f32[1,32], index: 2, kind: input, shape index: {}]   ;;  %s2454_s3 = inlined_call_operand.vmem [shape: bf16[4,32,8], index: 3, kind: input, shape index: {}]   ;;  %s2455_s4 = inlined_call_operand.vmem [shape: f32[4,1,8], index: 4, kind: input, shape index: {}]   ;;  %s2456_s5 = inlined_call_operand.vmem [shape: bf16[4,32,8], index: 5, kind: input, shape index: {}]   ;;  %s2457_s6 = inlined_call_operand.vmem [shape: f32[4,1,8], index: 6, kind: input, shape index: {}]   ;;  %s2458_s7 = inlined_call_operand.vmem [shape: bf16[4,32,8], index: 7, kind: input, shape index: {}]   ;;  %s2459_s8 = inlined_call_operand.vmem [shape: f32[4,1,8], index: 8, kind: input, shape index: {}]   ;;  %s2460_s9 = inlined_call_operand.vmem [shape: bf16[4,8,32], index: 9, kind: input, shape index: {}]   ;;  %s2461_s10 = inlined_call_operand.vmem [shape: f32[1,32], index: 10, kind: input, shape index: {}]   ;;  %s2462_s11 = inlined_call_operand.vmem [shape: f32[1,32], index: 11, kind: input, shape index: {}]   ;;  %s2463_s12 = inlined_call_operand.vmem [shape: f32[1,32], index: 12, kind: input, shape index: {}]   ;;  %s2464_s13 = inlined_call_operand.vmem [shape: bf16[32,64], index: 13, kind: input, shape index: {}]   ;;  %s2465_s14 = inlined_call_operand.vmem [shape: f32[1,64], index: 14, kind: input, shape index: {}]   ;;  %s2466_s15 = inlined_call_operand.vmem [shape: bf16[64,32], index: 15, kind: input, shape index: {}]   ;;  %s2467_s16 = inlined_call_operand.vmem [shape: f32[1,32], index: 16, kind: input, shape index: {}]   ;;  %s2468_s17 = inlined_call_operand.hbm [shape: f32[2,8,32], index: 17, kind: output, shape index: {}]  }
   0x1   :  { %2473 = sst [smem:[#allocation13_spill]] %s2451_s0 }
   0x2   :  { %2474 = sst [smem:[#allocation14_spill]] %s2452_s1 }
   0x3   :  { %2475 = sst [smem:[#allocation15_spill]] %s2453_s2 }
   0x4   :  { %2476 = sst [smem:[#allocation16_spill]] %s2454_s3 }
   0x5   :  { %22 = vsyncpa [#allocation6], 0 }
   0x6   :  { %24 = vsyncpa [#allocation6 + $0x1], 0  ;;  %s2117_s24 = smov 0   ;;  %s2119_s25 = smov 0  }
   0x7   :  { %s2121_s26 = smov 0   ;;  %s2123_s27 = smov 0  }
   0x8   :  { %s2125_s28 = smov 0   ;;  %s2127_s29 = smov 0  }
   0x9 LB: > { %2477 = sst [smem:[#allocation8_spill]] %s2004_s24  ;;  %s1629_s0 = sadd.s32 4294967295, %s2024_s29   ;;  %s2024_s29 = sphi %s2127_s29, %s30_s29   ;;  %s2020_s28 = sphi %s2125_s28, %s2492_s28   ;;  %s2016_s27 = sphi %s2123_s27, %s2491_s27   ;;  %s2012_s26 = sphi %s2121_s26, %s2490_s26   ;;  %s2008_s25 = sphi %s2119_s25, %s2494_s25   ;;  %s2004_s24 = sphi %s2117_s24, %s2493_s24  }
   0xa   : > { %2478 = sst [smem:[#allocation9_spill]] %s2012_s26  ;;  %s1630_s30 = sadd.s32 4294967294, %s2024_s29  }
   0xb   : > { %2479 = sst [smem:[#allocation10_spill]] %s2020_s28  ;;  %s42_s18 = sadd.s32 1, %s2020_s28 }
   0xc   : > { %s413_s19 = sadd.s32 1, %s2012_s26  ;;  %p44_p0 = scmp.ge.s32.totalorder %s42_s18, 2 }
   0xd   : > { %p423_p1 = scmp.ne.s32.totalorder %s2012_s26, %s2008_s25  ;;  %p424_p2 = scmp.eq.s32.totalorder %s1629_s0, 1 }
   0xe   : > { %p429_p3 = scmp.ne.s32.totalorder %s2008_s25, %s2004_s24  ;;  %s2496_s18 = smov (%p44_p0, %s42_s18), 0 }
   0xf   : > { %2480 = sst [smem:[#allocation11_spill]] %s2496_s18  ;;  %p2157_p4 = por %p424_p2, %p423_p1 }
  0x10   : > { %p430_p5 = scmp.eq.s32.totalorder %s1630_s30, 1  ;;  %s408_s20 = ssub.s32 %s2020_s28, %s2496_s18 }
  0x11   : > { %p1633_p6 = scmp.ge.s32.totalorder %s2024_s29, 1  ;;  %p411_p7 = scmp.eq.s32.totalorder %s408_s20, 0 }
  0x12   : > { %p2164_p8 = por %p430_p5, %p429_p3  ;;  %p503_p9 = scmp.lt.s32.totalorder %s2024_s29, 3 }
  0x13   : > { %s2170_s22 = scalar_select %p411_p7, %s2012_s26, %s413_s19  }
  0x14   : > { %p504_p10 = pnand %p1633_p6, %p503_p9 }
  0x15   : > { %2483 = sst [smem:[#allocation12_spill]] %s2170_s22  ;;  %p554_p11 = scmp.lt.s32.totalorder (!%p504_p10), %s2016_s27, 1 }
  0x16   : > { %507 = sbr.rel (%p504_p10) target bundleno = 1601 (0x641), region = 88  ;;  %s2484_s18 = sld [smem:[#allocation13_spill]] (!%p504_p10) }
  0x17   : > { %s2485_s20 = sld [smem:[#allocation14_spill]] (!%p504_p10)  ;;  %s1814_s26 = sshll.u32 (!%p504_p10), %s2016_s27, 3 }
  0x18   : > { %s2486_s2 = sld [smem:[#allocation15_spill]] (!%p504_p10) }
  0x19   : > { %s2487_s3 = sld [smem:[#allocation16_spill]] (!%p504_p10) }
  0x1b   : > { %s555_s23 = scalar_select %p554_p11, %s2016_s27, 1  ;;  %vm566_vm0 = vcmask 261120   ;;  %v2026_v2 = vmov 32.0   ;;  %v1818_v14 = vld [vmem:[%s2456_s5 + $0x8] sm:$0xff]  ;;  %v1822_v16 = vld [vmem:[%s2456_s5 + $0x18] sm:$0xff]  ;;  %v1817_v18 = vld [vmem:[%s2456_s5] sm:$0xff] }
  0x1c   : > { %1922 = vrcp.f32 %v2026_v2  ;;  %v1820_v15 = vld [vmem:[%s2458_s7 + $0x8] sm:$0xff]  ;;  %v1824_v17 = vld [vmem:[%s2458_s7 + $0x18] sm:$0xff]  ;;  %636 = vmatpush.bf16.msra.mxu0 %v1818_v14  ;;  %709 = vmatpush.bf16.msra.mxu2 %v1822_v16  ;;  %v1819_v19 = vld [vmem:[%s2458_s7] sm:$0xff]  ;;  %vm605_vm5 = vcmask 257024   ;;  %vm677_vm6 = vcmask 60416   ;;  %vm1065_vm7 = vcmask 64512  }
  0x1d   : > { %s1635_s0 = sshll.u32 %s555_s23, 3  ;;  %669 = vmatpush.bf16.msra.mxu1 %v1820_v15  ;;  %744 = vmatpush.bf16.msra.mxu3 %v1824_v17  ;;  %v1821_v20 = vld [vmem:[%s2456_s5 + $0x10] sm:$0xff]  ;;  %v1830_v23 = vld [vmem:[%s2456_s5 + $0x38] sm:$0xff]  ;;  %v1826_v24 = vld [vmem:[%s2456_s5 + $0x28] sm:$0xff]  ;;  %vm1185_vm8 = vcmask 1043456   ;;  %s551_s23 = sand.u32 1, %s2008_s25  }
  0x1e   : > { %s557_s28 = scalar_lea.vmem %s2484_s18, %s1635_s0  ;;  %v1823_v21 = vld [vmem:[%s2458_s7 + $0x10] sm:$0xff]  ;;  %v1828_v25 = vld [vmem:[%s2458_s7 + $0x28] sm:$0xff]  ;;  %v1832_v27 = vld [vmem:[%s2458_s7 + $0x38] sm:$0xff]  ;;  %s1634_s0 = sshll.u32 %s551_s23, 3 }
  0x1f   : > { %v2177_v0 = vld [vmem:[%s557_s28] sm:$0xff]  ;;  %v1829_v28 = vld [vmem:[%s2456_s5 + $0x30] sm:$0xff]  ;;  %v1838_v46 = vld [vmem:[%s2487_s3 + $0x28] sm:$0xff]  ;;  %s1552_s18 = scalar_lea.hbm %s2468_s17, %s1814_s26  ;;  %s553_s19 = scalar_lea.vmem [#allocation5], %s1634_s0 }
  0x20   : > { %v567_v1 = vsel %vm566_vm0, %v2177_v0, 0.0  ;;  %637 = vmatpush.bf16.msra.mxu0 %v1817_v18  ;;  %710 = vmatpush.bf16.msra.mxu2 %v1821_v20  ;;  %v1825_v29 = vld [vmem:[%s2456_s5 + $0x20] sm:$0xff]  ;;  %v1831_v32 = vld [vmem:[%s2458_s7 + $0x30] sm:$0xff]  ;;  %v1834_v47 = vld [vmem:[%s2487_s3 + $0x8] sm:$0xff]  ;;  %s1541_s27 = scalar_lea.sflag [#allocation6], %s551_s23  ;;  %s1966_s0 = scalar_lea.hbm %s2468_s17, 16 }
  0x21   : > { %568 = vadd.xlane.f32.xlu0 %v567_v1  ;;  %670 = vmatpush.bf16.msra.mxu1 %v1819_v19  ;;  %v1827_v31 = vld [vmem:[%s2458_s7 + $0x20] sm:$0xff]  ;;  %v1836_v48 = vld [vmem:[%s2487_s3 + $0x18] sm:$0xff]  ;;  %v1835_v52 = vld [vmem:[%s2487_s3 + $0x10] sm:$0xff] }
  0x22   : > { %v1923_v3 = vpop.eup %1922  ;;  %745 = vmatpush.bf16.msra.mxu3 %v1823_v21  ;;  %v1903_v39 = vld [vmem:[%s2485_s20] ss:$0 sm:$0xff]  ;;  %v1840_v49 = vld [vmem:[%s2487_s3 + $0x38] sm:$0xff]  ;;  %v1839_v53 = vld [vmem:[%s2487_s3 + $0x30] sm:$0xff]  ;;  %s1554_s20 = sshll.u32 %s553_s19, 4  ;;  %s1555_s20 = int_to_ptr.vmem [resolvable:$true] %s1554_s20 }
  0x23   : > { %v571_v4 = vmul.f32 32.0, %v1923_v3  ;;  %vm575_vm1 = vweird.f32 %v1923_v3  ;;  %v1904_v41 = vld [vmem:[%s2486_s2] ss:$0 sm:$0xff]  ;;  %v1907_v63 = vld [vmem:[%s2457_s6 + $0x1] ss:$0 sm:$0xff]  ;;  %s1556_s2 = sshll.u32 %s1552_s18, 4  ;;  %s1557_s2 = int_to_ptr.hbm [resolvable:$true] %s1556_s2 }
  0x24   : > { %861 = vmatpush.bf16.msrb.mxu2 %v1830_v23  ;;  %785 = vmatpush.bf16.msrb.mxu0 %v1826_v24  ;;  %v1837_v50 = vld [vmem:[%s2487_s3 + $0x20] sm:$0xff] }
  0x25   : > { %v572_v5 = vsub.f32 1.0, %v571_v4  ;;  %820 = vmatpush.bf16.msrb.mxu1 %v1828_v25  ;;  %v1833_v51 = vld [vmem:[%s2487_s3] sm:$0xff]  ;;  %s1960_s3 = sshra.s32 %s1557_s2, 4  ;;  %s1961_s3 = int_to_ptr.hbm [resolvable:$true] %s1960_s3 }
  0x26   : > { %896 = vmatpush.bf16.msrb.mxu3 %v1832_v27  ;;  %v1905_v55 = vld [vmem:[%s2457_s6] ss:$0 sm:$0xff]  ;;  %v1908_v1 = vld [vmem:[%s2459_s8 + $0x1] ss:$0 sm:$0xff]  ;;  %s1962_s22 = scalar_lea.hbm %s1961_s3, 8  ;;  %p1967_p1 = scmp.lt.s32.totalorder %s1961_s3, %s2468_s17 }
  0x27   : > { %v573_v6 = vmul.f32 %v1923_v3, %v572_v5  ;;  %v1906_v56 = vld [vmem:[%s2459_s8] ss:$0 sm:$0xff]  ;;  %p1963_p12 = scmp.ne.s32.totalorder %s1961_s3, %s1962_s22  ;;  %p1968_p2 = scmp.lt.s32.totalorder %s1966_s0, %s1962_s22 }
  0x28   : > { %862 = vmatpush.bf16.msrb.mxu2 %v1829_v28  ;;  %786 = vmatpush.bf16.msrb.mxu0 %v1825_v29  ;;  %v1912_v29 = vld [vmem:[%s2459_s8 + $0x3] ss:$0 sm:$0xff] }
  0x29   : > { %v574_v7 = vadd.f32 %v1923_v3, %v573_v6  ;;  %821 = vmatpush.bf16.msrb.mxu1 %v1827_v31  ;;  %p1964_p13 = pnand %p1963_p12, %p2157_p4  ;;  %p1969_p3 = por %p1968_p2, %p1967_p1 }
  0x2a   : > { %897 = vmatpush.bf16.msrb.mxu3 %v1831_v32 }
  0x2b   : > { %v2181_v8 = vsel %vm575_vm1, %v1923_v3, %v574_v7  ;;  %vm1521_vm1 = vcmask 523264   ;;  %p1965_p0 = pneg %p1964_p13 }
  0x2d   : > { %p1970_p5 = pnand %p1969_p3, %p1965_p0 }
  0x94   : > { %v569_v9 = vpop.xlane.xlu0 %568 }
  0x95   : > { %v577_v10 = vmul.f32 %v2181_v8, %v569_v9 }
  0x97   : > { %v578_v11 = vsub.f32 %v2177_v0, %v577_v10 }
  0x99   : > { %v579_v12 = vmul.f32 %v578_v11, %v578_v11 }
  0x9b   : > { %v580_v13 = vsel %vm566_vm0, %v579_v12, 0.0 }
  0x9c   : > { %581 = vadd.xlane.f32.xlu0 %v580_v13  ;;  %v1910_v13 = vld [vmem:[%s2459_s8 + $0x2] ss:$0 sm:$0xff] }
 0x10f   : > { %v582_v22 = vpop.xlane.xlu0 %581 }
 0x110   : > { %v583_v26 = vmul.f32 %v582_v22, %v2181_v8 }
 0x112   : > { %v584_v30 = vadd.f32 1e-05, %v583_v26  ;;  %v1911_v26 = vld [vmem:[%s2457_s6 + $0x3] ss:$0 sm:$0xff] }
 0x114   : > { %1924 = vrsqrt.f32 %v584_v30  ;;  %vm591_vm3 = vweird.f32 %v584_v30 }
 0x11a   : > { %v1925_v33 = vpop.eup %1924 }
 0x11b   : > { %v586_v34 = vmul.f32 %v1925_v33, %v584_v30  ;;  %vm592_vm2 = vweird.f32 %v1925_v33 }
 0x11c   : > { %vm593_vm4 = vmor %vm591_vm3, %vm592_vm2 }
 0x11d   : > { %v587_v35 = vmul.f32 %v1925_v33, %v586_v34 }
 0x11f   : > { %v588_v36 = vmul.f32 0.5, %v587_v35 }
 0x121   : > { %v589_v37 = vsub.f32 1.5, %v588_v36 }
 0x123   : > { %v590_v38 = vmul.f32 %v1925_v33, %v589_v37 }
 0x125   : > { %v594_v40 = vsel %vm593_vm4, %v1925_v33, %v590_v38 }
 0x126   : > { %v595_v42 = vmul.f32 %v594_v40, %v578_v11  ;;  %v1909_v11 = vld [vmem:[%s2457_s6 + $0x2] ss:$0 sm:$0xff] }
 0x128   : > { %v599_v43 = vmul.f32 %v1903_v39, %v595_v42  ;;  %v1913_v39 = vld [vmem:[%s2455_s4] ss:$0 sm:$0xff] }
 0x12a   : > { %v603_v44 = vadd.f32 %v1904_v41, %v599_v43  ;;  %v1914_v41 = vld [vmem:[%s2455_s4 + $0x1] ss:$0 sm:$0xff] }
 0x12c   : > { %v604_v45 = vpack.c.bf16 %v603_v44, %v603_v44 }
 0x12e   : > { %1644 = vmatmul.msk.bf16.vlgmr.msra.gmra.mxu0 %vm566_vm0, %v604_v45  ;;  %1653 = vmatmul.msk.bf16.vlgmr.msra.gmra.mxu1 %vm566_vm0, %v604_v45  ;;  %606 = vst.msk [vmem:[#allocation4] sm:$0xf] %vm605_vm5, %v604_v45 }
 0x12f   : > { %1667 = vmatmul.msk.bf16.vlgmr.msra.gmra.mxu2 %vm566_vm0, %v604_v45  ;;  %1681 = vmatmul.msk.bf16.vlgmr.msra.gmra.mxu3 %vm566_vm0, %v604_v45 }
 0x130   : > { %1021 = vmatpush.bf16.msra.mxu2 %v1838_v46  ;;  %971 = vmatpush.bf16.msra.mxu0 %v1834_v47 }
 0x131   : > { %996 = vmatpush.bf16.msra.mxu1 %v1836_v48  ;;  %1046 = vmatpush.bf16.msra.mxu3 %v1840_v49 }
 0x134   : > { %1022 = vmatpush.bf16.msra.mxu2 %v1837_v50  ;;  %972 = vmatpush.bf16.msra.mxu0 %v1833_v51 }
 0x135   : > { %997 = vmatpush.bf16.msra.mxu1 %v1835_v52  ;;  %1047 = vmatpush.bf16.msra.mxu3 %v1839_v53  ;;  %v916_v54 = vld [vmem:[#allocation4] sm:$0xf] }
 0x13e   : > { %1695 = vmatmul.msk.bf16.vlgmr.msrb.gmra.mxu0 %vm566_vm0, %v604_v45  ;;  %1709 = vmatmul.msk.bf16.vlgmr.msrb.gmra.mxu1 %vm566_vm0, %v604_v45 }
 0x13f   : > { %1723 = vmatmul.msk.bf16.vlgmr.msrb.gmra.mxu2 %vm566_vm0, %v604_v45  ;;  %1737 = vmatmul.msk.bf16.vlgmr.msrb.gmra.mxu3 %vm566_vm0, %v604_v45 }
 0x14e   : > { %1746 = vmatmul.msk.bf16.vlgmr.msra.gmra.mxu0 %vm566_vm0, %v916_v54  ;;  %1755 = vmatmul.msk.bf16.vlgmr.msra.gmra.mxu1 %vm566_vm0, %v916_v54 }
 0x14f   : > { %1764 = vmatmul.msk.bf16.vlgmr.msra.gmra.mxu2 %vm566_vm0, %v916_v54  ;;  %1773 = vmatmul.msk.bf16.vlgmr.msra.gmra.mxu3 %vm566_vm0, %v916_v54  ;;  %v1915_v54 = vld [vmem:[%s2455_s4 + $0x2] ss:$0 sm:$0xff] }
 0x1ab   : > { %v639_v57 = vpop.f32.mrf.mxu0  ;;  %v672_v58 = vpop.f32.mrf.mxu1 }
 0x1ac   : > { %v640_v59 = vadd.f32 %v1905_v55, %v639_v57  ;;  %v673_v60 = vadd.f32 %v1906_v56, %v672_v58  ;;  %v1916_v57 = vld [vmem:[%s2455_s4 + $0x3] ss:$0 sm:$0xff] }
 0x1ae   : > { %v676_v61 = vpack.c.bf16 %v640_v59, %v640_v59  ;;  %v679_v62 = vpack.c.bf16 %v673_v60, %v673_v60 }
 0x1b0   : > { %678 = vst.msk [vmem:[#allocation2] sm:$0xf] %vm677_vm6, %v676_v61 }
 0x1b1   : > { %680 = vst.msk [vmem:[#allocation3] sm:$0xf] %vm677_vm6, %v679_v62 }
 0x1b2   : > { %v712_v2 = vpop.f32.mrf.mxu2  ;;  %v747_v3 = vpop.f32.mrf.mxu3 }
 0x1b3   : > { %v713_v4 = vadd.f32 %v1907_v63, %v712_v2  ;;  %v748_v5 = vadd.f32 %v1908_v1, %v747_v3  ;;  %v641_v6 = vpop.f32.mrf.mxu0  ;;  %v674_v7 = vpop.f32.mrf.mxu1 }
 0x1b5   : > { %v751_v9 = vpack.c.bf16 %v713_v4, %v713_v4  ;;  %v754_v10 = vpack.c.bf16 %v748_v5, %v748_v5 }
 0x1b7   : > { %753 = vst.msk [vmem:[#allocation2 + $0x4] sm:$0xf] %vm677_vm6, %v751_v9  ;;  %v1057_v12 = vld [vmem:[#allocation2] sm:$0xf] }
 0x1b8   : > { %756 = vst.msk [vmem:[#allocation3 + $0x4] sm:$0xf] %vm677_vm6, %v754_v10  ;;  %v1070_v14 = vsel %vm1065_vm7, %v1057_v12, 0  ;;  %v1061_v15 = vld [vmem:[#allocation3] sm:$0xf] }
 0x1b9   : > { %1079 = vmatpush.bf16.xpose.msrb.mxu0 %v1070_v14  ;;  %v1187_v16 = vsel %vm1185_vm8, %v1061_v15, 0 }
 0x1ba   : > { %v714_v17 = vpop.f32.mrf.mxu2  ;;  %v749_v18 = vpop.f32.mrf.mxu3 }
 0x1bb   : > { %v788_v19 = vpop.f32.mrf.mxu0  ;;  %v823_v20 = vpop.f32.mrf.mxu1 }
 0x1bc   : > { %v789_v21 = vadd.f32 %v1909_v11, %v788_v19  ;;  %v824_v22 = vadd.f32 %v1910_v13, %v823_v20 }
 0x1be   : > { %v827_v23 = vpack.c.bf16 %v789_v21, %v789_v21  ;;  %v830_v24 = vpack.c.bf16 %v824_v22, %v824_v22  ;;  %v1058_v25 = vld [vmem:[#allocation2 + $0x4] sm:$0xf] }
 0x1bf   : > { %v1089_v27 = vsel %vm1065_vm7, %v1058_v25, 0  ;;  %v1062_v28 = vld [vmem:[#allocation3 + $0x4] sm:$0xf] }
 0x1c0   : > { %829 = vst.msk [vmem:[#allocation2 + $0x8] sm:$0xf] %vm677_vm6, %v827_v23  ;;  %1098 = vmatpush.bf16.xpose.msrb.mxu1 %v1089_v27  ;;  %v1206_v30 = vsel %vm1185_vm8, %v1062_v28, 0 }
 0x1c1   : > { %1196 = vmatpush.bf16.msra.mxu0 %v1187_v16  ;;  %832 = vst.msk [vmem:[#allocation3 + $0x8] sm:$0xf] %vm677_vm6, %v830_v24 }
 0x1c2   : > { %v864_v31 = vpop.f32.mrf.mxu2  ;;  %v899_v32 = vpop.f32.mrf.mxu3 }
 0x1c3   : > { %v865_v33 = vadd.f32 %v1911_v26, %v864_v31  ;;  %v900_v34 = vadd.f32 %v1912_v29, %v899_v32  ;;  %v790_v35 = vpop.f32.mrf.mxu0  ;;  %v825_v36 = vpop.f32.mrf.mxu1 }
 0x1c5   : > { %v903_v37 = vpack.c.bf16 %v865_v33, %v865_v33  ;;  %v906_v38 = vpack.c.bf16 %v900_v34, %v900_v34 }
 0x1c7   : > { %905 = vst.msk [vmem:[#allocation2 + $0xc] sm:$0xf] %vm677_vm6, %v903_v37  ;;  %v1059_v40 = vld [vmem:[#allocation2 + $0x8] sm:$0xf] }
 0x1c8   : > { %1215 = vmatpush.bf16.msra.mxu1 %v1206_v30  ;;  %908 = vst.msk [vmem:[#allocation3 + $0xc] sm:$0xf] %vm677_vm6, %v906_v38  ;;  %v1108_v42 = vsel %vm1065_vm7, %v1059_v40, 0  ;;  %v1063_v43 = vld [vmem:[#allocation3 + $0x8] sm:$0xf] }
 0x1c9   : > { %1117 = vmatpush.bf16.xpose.msrb.mxu2 %v1108_v42  ;;  %v1225_v44 = vsel %vm1185_vm8, %v1063_v43, 0  ;;  %v1271_v43 = vld [vmem:[%s2460_s9] sm:$0xf] }
 0x1ca   : > { %v866_v45 = vpop.f32.mrf.mxu2  ;;  %v901_v46 = vpop.f32.mrf.mxu3 }
 0x1cb   : > { %v974_v47 = vpop.f32.mrf.mxu0  ;;  %v999_v48 = vpop.f32.mrf.mxu1  ;;  %v1272_v45 = vld [vmem:[%s2460_s9 + $0x4] sm:$0xf] }
 0x1cc   : > { %v975_v49 = vadd.f32 %v1913_v39, %v974_v47  ;;  %v1000_v50 = vadd.f32 %v1914_v41, %v999_v48  ;;  %v1298_v46 = vsel %vm1185_vm8, %v1272_v45, 0  ;;  %v1273_v47 = vld [vmem:[%s2460_s9 + $0x8] sm:$0xf] }
 0x1cd   : > { %v1317_v48 = vsel %vm1185_vm8, %v1273_v47, 0  ;;  %v1918_v47 = vld [vmem:[%s2462_s11] ss:$0 sm:$0xff] }
 0x1ce   : > { %v1053_v51 = vpack.c.bf16 %v975_v49, %v975_v49  ;;  %v1054_v52 = vpack.c.bf16 %v1000_v50, %v1000_v50  ;;  %v1060_v53 = vld [vmem:[#allocation2 + $0xc] sm:$0xf] }
 0x1cf   : > { %v1127_v55 = vsel %vm1065_vm7, %v1060_v53, 0  ;;  %v1064_v56 = vld [vmem:[#allocation3 + $0xc] sm:$0xf]  ;;  %v1274_v49 = vld [vmem:[%s2460_s9 + $0xc] sm:$0xf] }
 0x1d0   : > { %1136 = vmatpush.bf16.xpose.msrb.mxu3 %v1127_v55  ;;  %1774 = vmatmul.msk.bf16.vlgmr.msrb.gmra.mxu0 %vm1065_vm7, %v1053_v51  ;;  %v1244_v58 = vsel %vm1185_vm8, %v1064_v56, 0  ;;  %v1336_v51 = vsel %vm1185_vm8, %v1274_v49, 0 }
 0x1d1   : > { %1234 = vmatpush.bf16.msra.mxu2 %v1225_v44  ;;  %1775 = vmatmul.msk.bf16.vlgmr.msrb.gmra.mxu1 %vm1065_vm7, %v1054_v52  ;;  %v1279_v44 = vsel %vm1185_vm8, %v1271_v43, 0 }
 0x1d2   : > { %v1024_v59 = vpop.f32.mrf.mxu2  ;;  %v1049_v60 = vpop.f32.mrf.mxu3  ;;  %1288 = vmatpush.bf16.msrb.mxu0 %v1279_v44  ;;  %1307 = vmatpush.bf16.msrb.mxu1 %v1298_v46 }
 0x1d3   : > { %v1025_v61 = vadd.f32 %v1915_v54, %v1024_v59  ;;  %v1050_v62 = vadd.f32 %v1916_v57, %v1049_v60  ;;  %v976_v63 = vpop.f32.mrf.mxu0  ;;  %v1001_v1 = vpop.f32.mrf.mxu1 }
 0x1d5   : > { %v1055_v2 = vpack.c.bf16 %v1025_v61, %v1025_v61  ;;  %v1056_v3 = vpack.c.bf16 %v1050_v62, %v1050_v62 }
 0x1d7   : > { %1776 = vmatmul.msk.bf16.vlgmr.msrb.gmra.mxu2 %vm1065_vm7, %v1055_v2  ;;  %1777 = vmatmul.msk.bf16.vlgmr.msrb.gmra.mxu3 %vm1065_vm7, %v1056_v3 }
 0x1d8   : > { %1253 = vmatpush.bf16.msra.mxu3 %v1244_v58  ;;  %1326 = vmatpush.bf16.msrb.mxu2 %v1317_v48 }
 0x1da   : > { %v1026_v4 = vpop.f32.mrf.mxu2  ;;  %v1051_v5 = vpop.f32.mrf.mxu3 }
 0x1dc   : > { %1345 = vmatpush.bf16.msrb.mxu3 %v1336_v51 }
 0x24d   : > { %v1081_v6 = vpop.f32.mrf.mxu0 }
 0x24e   : > { %v1100_v7 = vpop.f32.mrf.mxu1  ;;  %v1142_v9 = vsel %vm1065_vm7, %v1081_v6, -inf }
 0x24f   : > { %1143 = vmax.xlane.f32.xlu2 %v1142_v9  ;;  %v1145_v12 = vsel %vm1065_vm7, %v1100_v7, -inf }
 0x255   : > { %v1083_v10 = vpop.f32.mrf.mxu0 }
 0x256   : > { %v1102_v11 = vpop.f32.mrf.mxu1 }
 0x257   : > { %1146 = vmax.xlane.f32.xlu2 %v1145_v12 }
 0x25a   : > { %v1119_v13 = vpop.f32.mrf.mxu2  ;;  %v1138_v14 = vpop.f32.mrf.mxu3 }
 0x25b   : > { %v1148_v15 = vsel %vm1065_vm7, %v1119_v13, -inf  ;;  %v1151_v18 = vsel %vm1065_vm7, %v1138_v14, -inf }
 0x25c   : > { %1149 = vmax.xlane.f32.xlu1 %v1148_v15 }
 0x262   : > { %v1121_v16 = vpop.f32.mrf.mxu2  ;;  %v1140_v17 = vpop.f32.mrf.mxu3 }
 0x264   : > { %1152 = vmax.xlane.f32.xlu1 %v1151_v18 }
 0x2c2   : > { %v1144_v19 = vpop.xlane.xlu2 %1143 }
 0x2c3   : > { %v1154_v20 = vsub.f32 %v1081_v6, %v1144_v19 }
 0x2c5   : > { %v1158_v21 = vmul.f32 1.442695, %v1154_v20 }
 0x2c7   : > { %1926 = vpow2.f32 %v1158_v21 }
 0x2ca   : > { %v1147_v22 = vpop.xlane.xlu2 %1146 }
 0x2cb   : > { %v1155_v23 = vsub.f32 %v1100_v7, %v1147_v22 }
 0x2cd   : > { %v1927_v24 = vpop.eup %1926  ;;  %v1160_v25 = vmul.f32 1.442695, %v1155_v23 }
 0x2ce   : > { %v1178_v26 = vpack.c.bf16 %v1927_v24, %v1927_v24  ;;  %v1166_v27 = vsel %vm1065_vm7, %v1927_v24, 0.0 }
 0x2cf   : > { %1928 = vpow2.f32 %v1160_v25  ;;  %v1150_v28 = vpop.xlane.xlu1 %1149  ;;  %1167 = vadd.xlane.f32.xlu2 %v1166_v27  ;;  %v1917_v25 = vld [vmem:[%s2461_s10] ss:$0 sm:$0xff] }
 0x2d0   : > { %v1156_v29 = vsub.f32 %v1119_v13, %v1150_v28  ;;  %1778 = vmatmul.msk.bf16.vlgmr.msra.gmra.mxu0 %vm1065_vm7, %v1178_v26 }
 0x2d2   : > { %v1162_v30 = vmul.f32 1.442695, %v1156_v29 }
 0x2d4   : > { %1930 = vpow2.f32 %v1162_v30 }
 0x2d5   : > { %v1929_v31 = vpop.eup %1928 }
 0x2d6   : > { %v1179_v32 = vpack.c.bf16 %v1929_v31, %v1929_v31  ;;  %v1169_v42 = vsel %vm1065_vm7, %v1929_v31, 0.0 }
 0x2d7   : > { %v1153_v33 = vpop.xlane.xlu1 %1152 }
 0x2d8   : > { %v1157_v34 = vsub.f32 %v1138_v14, %v1153_v33  ;;  %1779 = vmatmul.msk.bf16.vlgmr.msra.gmra.mxu1 %vm1065_vm7, %v1179_v32 }
 0x2da   : > { %v1931_v35 = vpop.eup %1930  ;;  %v1164_v36 = vmul.f32 1.442695, %v1157_v34 }
 0x2db   : > { %v1180_v37 = vpack.c.bf16 %v1931_v35, %v1931_v35  ;;  %v1172_v38 = vsel %vm1065_vm7, %v1931_v35, 0.0 }
 0x2dc   : > { %1932 = vpow2.f32 %v1164_v36  ;;  %1173 = vadd.xlane.f32.xlu0 %v1172_v38 }
 0x2dd   : > { %1780 = vmatmul.msk.bf16.vlgmr.msra.gmra.mxu2 %vm1065_vm7, %v1180_v37  ;;  %v1842_v37 = vld [vmem:[%s2464_s13 + $0x8] sm:$0xff] }
 0x2de   : > { %1433 = vmatpush.bf16.msra.mxu0 %v1842_v37 }
 0x2e2   : > { %v1933_v39 = vpop.eup %1932 }
 0x2e3   : > { %v1181_v40 = vpack.c.bf16 %v1933_v39, %v1933_v39  ;;  %v1175_v41 = vsel %vm1065_vm7, %v1933_v39, 0.0 }
 0x2e4   : > { %1176 = vadd.xlane.f32.xlu1 %v1175_v41  ;;  %1170 = vadd.xlane.f32.xlu0 %v1169_v42 }
 0x2e5   : > { %1781 = vmatmul.msk.bf16.vlgmr.msra.gmra.mxu3 %vm1065_vm7, %v1181_v40 }
 0x342   : > { %v1168_v50 = vpop.xlane.xlu2 %1167 }
 0x343   : > { %1934 = vrcp.f32 %v1168_v50 }
 0x349   : > { %v1935_v52 = vpop.eup %1934 }
 0x34d   : > { %v1198_v53 = vpop.f32.mrf.mxu0 }
 0x34e   : > { %v1263_v54 = vmul.f32 %v1935_v52, %v1198_v53  ;;  %v1920_v53 = vld [vmem:[%s2465_s14] ss:$0 sm:$0xff] }
 0x34f   : > { %v1174_v55 = vpop.xlane.xlu0 %1173 }
 0x350   : > { %v1267_v56 = vpack.c.bf16 %v1263_v54, %v1263_v54 }
 0x352   : > { %1782 = vmatmul.msk.bf16.vlgmr.msrb.gmra.mxu0 %vm1065_vm7, %v1267_v56 }
 0x355   : > { %v1200_v57 = vpop.f32.mrf.mxu0  ;;  %v1217_v58 = vpop.f32.mrf.mxu1 }
 0x357   : > { %v1171_v59 = vpop.xlane.xlu0 %1170  ;;  %v1177_v62 = vpop.xlane.xlu1 %1176 }
 0x358   : > { %1936 = vrcp.f32 %v1171_v59 }
 0x359   : > { %1938 = vrcp.f32 %v1174_v55 }
 0x35a   : > { %1940 = vrcp.f32 %v1177_v62 }
 0x35d   : > { %v1219_v60 = vpop.f32.mrf.mxu1 }
 0x35e   : > { %v1937_v61 = vpop.eup %1936  ;;  %v1846_v60 = vld [vmem:[%s2466_s15 + $0x18] sm:$0xff] }
 0x35f   : > { %v1939_v63 = vpop.eup %1938  ;;  %v1264_v1 = vmul.f32 %v1937_v61, %v1217_v58  ;;  %1529 = vmatpush.bf16.msra.mxu1 %v1846_v60 }
 0x360   : > { %v1236_v2 = vpop.f32.mrf.mxu2  ;;  %v1941_v6 = vpop.eup %1940 }
 0x361   : > { %v1265_v3 = vmul.f32 %v1939_v63, %v1236_v2  ;;  %v1268_v4 = vpack.c.bf16 %v1264_v1, %v1264_v1  ;;  %v1845_v2 = vld [vmem:[%s2466_s15 + $0x10] sm:$0xff] }
 0x363   : > { %v1269_v5 = vpack.c.bf16 %v1265_v3, %v1265_v3  ;;  %1783 = vmatmul.msk.bf16.vlgmr.msrb.gmra.mxu1 %vm1065_vm7, %v1268_v4 }
 0x364   : > { %1530 = vmatpush.bf16.msra.mxu1 %v1845_v2 }
 0x365   : > { %1784 = vmatmul.msk.bf16.vlgmr.msrb.gmra.mxu2 %vm1065_vm7, %v1269_v5 }
 0x368   : > { %v1238_v7 = vpop.f32.mrf.mxu2  ;;  %v1255_v9 = vpop.f32.mrf.mxu3 }
 0x369   : > { %v1266_v10 = vmul.f32 %v1941_v6, %v1255_v9  ;;  %v1844_v7 = vld [vmem:[%s2466_s15 + $0x8] sm:$0xff] }
 0x36a   : > { %1531 = vmatpush.bf16.msra.mxu1 %v1844_v7 }
 0x36b   : > { %v1270_v11 = vpack.c.bf16 %v1266_v10, %v1266_v10 }
 0x36d   : > { %1785 = vmatmul.msk.bf16.vlgmr.msrb.gmra.mxu3 %vm1065_vm7, %v1270_v11 }
 0x370   : > { %v1257_v12 = vpop.f32.mrf.mxu3 }
 0x371   : > { %v1843_v12 = vld [vmem:[%s2466_s15] sm:$0xff] }
 0x372   : > { %1532 = vmatpush.bf16.msra.mxu1 %v1843_v12 }
 0x3cf   : > { %v1290_v13 = vpop.f32.mrf.mxu0 }
 0x3d0   : > { %v1351_v19 = vsel %vm566_vm0, %v1290_v13, 0.0 }
 0x3d7   : > { %v1292_v14 = vpop.f32.mrf.mxu0 }
 0x3e0   : > { %v1309_v15 = vpop.f32.mrf.mxu1 }
 0x3e1   : > { %v1352_v18 = vsel %vm566_vm0, %v1309_v15, 0.0 }
 0x3e2   : > { %v1353_v21 = vadd.f32 %v1352_v18, %v1351_v19 }
 0x3e8   : > { %v1328_v16 = vpop.f32.mrf.mxu2  ;;  %v1311_v17 = vpop.f32.mrf.mxu1 }
 0x3e9   : > { %v1354_v20 = vsel %vm566_vm0, %v1328_v16, 0.0 }
 0x3ea   : > { %v1355_v22 = vadd.f32 %v1354_v20, %v1353_v21 }
 0x3f0   : > { %v1330_v23 = vpop.f32.mrf.mxu2  ;;  %v1347_v24 = vpop.f32.mrf.mxu3 }
 0x3f1   : > { %v1356_v26 = vsel %vm566_vm0, %v1347_v24, 0.0 }
 0x3f2   : > { %v1357_v27 = vadd.f32 %v1356_v26, %v1355_v22 }
 0x3f4   : > { %v1362_v28 = vadd.f32 %v1917_v25, %v1357_v27 }
 0x3f6   : > { %v2373_v29 = vadd.f32 %v1362_v28, %v2177_v0  ;;  %v1841_v0 = vld [vmem:[%s2464_s13] sm:$0xff] }
 0x3f7   : > { %1434 = vmatpush.bf16.msra.mxu0 %v1841_v0 }
 0x3f8   : > { %v1349_v30 = vpop.f32.mrf.mxu3  ;;  %v1366_v31 = vsel %vm566_vm0, %v2373_v29, 0.0 }
 0x3f9   : > { %1367 = vadd.xlane.f32.xlu1 %v1366_v31 }
 0x46c   : > { %v1368_v32 = vpop.xlane.xlu1 %1367 }
 0x46d   : > { %v1376_v33 = vmul.f32 %v1368_v32, %v2181_v8 }
 0x46f   : > { %v1377_v34 = vsub.f32 %v2373_v29, %v1376_v33 }
 0x471   : > { %v1378_v35 = vmul.f32 %v1377_v34, %v1377_v34 }
 0x473   : > { %v1379_v36 = vsel %vm566_vm0, %v1378_v35, 0.0 }
 0x474   : > { %1380 = vadd.xlane.f32.xlu2 %v1379_v36 }
 0x4e7   : > { %v1381_v38 = vpop.xlane.xlu2 %1380 }
 0x4e8   : > { %v1382_v39 = vmul.f32 %v1381_v38, %v2181_v8  ;;  %v1919_v8 = vld [vmem:[%s2463_s12] ss:$0 sm:$0xff] }
 0x4ea   : > { %v1383_v40 = vadd.f32 1e-05, %v1382_v39  ;;  %v1921_v39 = vld [vmem:[%s2467_s16] ss:$0 sm:$0xff] }
 0x4ec   : > { %1942 = vrsqrt.f32 %v1383_v40  ;;  %vm1390_vm10 = vweird.f32 %v1383_v40 }
 0x4f2   : > { %v1943_v41 = vpop.eup %1942 }
 0x4f3   : > { %v1385_v42 = vmul.f32 %v1943_v41, %v1383_v40  ;;  %vm1391_vm9 = vweird.f32 %v1943_v41 }
 0x4f4   : > { %vm1392_vm11 = vmor %vm1390_vm10, %vm1391_vm9 }
 0x4f5   : > { %v1386_v43 = vmul.f32 %v1943_v41, %v1385_v42 }
 0x4f7   : > { %v1387_v44 = vmul.f32 0.5, %v1386_v43 }
 0x4f9   : > { %v1388_v45 = vsub.f32 1.5, %v1387_v44 }
 0x4fb   : > { %v1389_v46 = vmul.f32 %v1943_v41, %v1388_v45 }
 0x4fd   : > { %v1393_v48 = vsel %vm1392_vm11, %v1943_v41, %v1389_v46 }
 0x4fe   : > { %v1394_v49 = vmul.f32 %v1393_v48, %v1377_v34 }
 0x500   : > { %v1398_v50 = vmul.f32 %v1918_v47, %v1394_v49 }
 0x502   : > { %v1402_v51 = vadd.f32 %v1919_v8, %v1398_v50 }
 0x504   : > { %v1403_v52 = vpack.c.bf16 %v1402_v51, %v1402_v51 }
 0x506   : > { %1794 = vmatmul.msk.bf16.vlgmr.msra.gmra.mxu0 %vm566_vm0, %v1403_v52 }
 0x583   : > { %v1436_v54 = vpop.f32.mrf.mxu0 }
 0x584   : > { %v1437_v55 = vadd.f32 %v1920_v53, %v1436_v54 }
 0x586   : > { %v1441_v56 = vmul.f32 0.70710677, %v1437_v55  ;;  %v1440_v36 = vmul.f32 0.5, %v1437_v55 }
 0x588   : > { %v1442_v57 = vmul.f32 %v1441_v56, %v1441_v56 }
 0x58a   : > { %v1443_v58 = vmin.f32 %v1442_v57, 16.0 }
 0x58b   : > { %v1438_v59 = vpop.f32.mrf.mxu0 }
 0x58c   : > { %v1444_v61 = vmul.f32 2.1237322e-06, %v1443_v58  ;;  %v1455_v62 = vmul.f32 3.8918573e-05, %v1443_v58 }
 0x58e   : > { %v1445_v63 = vadd.f32 0.00028619796, %v1444_v61  ;;  %v1456_v1 = vadd.f32 0.001143296, %v1455_v62 }
 0x590   : > { %v1446_v3 = vmul.f32 %v1445_v63, %v1443_v58  ;;  %v1457_v4 = vmul.f32 %v1456_v1, %v1443_v58 }
 0x592   : > { %v1458_v5 = vadd.f32 0.014752088, %v1457_v4  ;;  %v1447_v6 = vadd.f32 0.0036580483, %v1446_v3 }
 0x594   : > { %v1459_v9 = vmul.f32 %v1458_v5, %v1443_v58  ;;  %v1448_v11 = vmul.f32 %v1447_v6, %v1443_v58 }
 0x596   : > { %v1460_v10 = vadd.f32 0.112945676, %v1459_v9  ;;  %v1449_v15 = vadd.f32 0.05243302, %v1448_v11 }
 0x598   : > { %v1461_v13 = vmul.f32 %v1460_v10, %v1443_v58  ;;  %v1450_v18 = vmul.f32 %v1449_v15, %v1443_v58 }
 0x59a   : > { %v1462_v14 = vadd.f32 0.4994258, %v1461_v13  ;;  %v1451_v19 = vadd.f32 0.18741608, %v1450_v18 }
 0x59c   : > { %v1463_v16 = vmul.f32 %v1462_v14, %v1443_v58  ;;  %v1452_v21 = vmul.f32 %v1451_v19, %v1443_v58 }
 0x59e   : > { %v1464_v17 = vadd.f32 1.0, %v1463_v16  ;;  %v1453_v25 = vadd.f32 1.1283791, %v1452_v21 }
 0x5a0   : > { %1944 = vrcp.f32 %v1464_v17  ;;  %v1476_v24 = vand.u32 2147483648, %v1464_v17  ;;  %v1474_v27 = vand.u32 2147483647, %v1464_v17  ;;  %vm1470_vm13 = vweird.f32 %v1464_v17 }
 0x5a1   : > { %v1454_v31 = vmul.f32 %v1453_v25, %v1441_v56 }
 0x5a2   : > { %v1477_v30 = vor.u32 1.1754944e-38, %v1476_v24  ;;  %vm1475_vm15 = vcmp.eq.f32.partialorder %v1474_v27, 8.507059e+37 }
 0x5a6   : > { %v1945_v20 = vpop.eup %1944 }
 0x5a7   : > { %v1466_v22 = vmul.f32 %v1945_v20, %v1464_v17  ;;  %vm1471_vm12 = vweird.f32 %v1945_v20 }
 0x5a8   : > { %vm1472_vm14 = vmor %vm1470_vm13, %vm1471_vm12 }
 0x5a9   : > { %v1467_v23 = vsub.f32 1.0, %v1466_v22 }
 0x5ab   : > { %v1468_v26 = vmul.f32 %v1945_v20, %v1467_v23 }
 0x5ad   : > { %v1469_v28 = vadd.f32 %v1945_v20, %v1468_v26 }
 0x5af   : > { %v1473_v32 = vsel %vm1472_vm14, %v1945_v20, %v1469_v28 }
 0x5b0   : > { %v1478_v33 = vsel %vm1475_vm15, %v1477_v30, %v1473_v32 }
 0x5b1   : > { %v1479_v34 = vmul.f32 %v1478_v33, %v1454_v31 }
 0x5b3   : > { %v1795_v35 = vclamps-f32 %v1479_v34, 1.0 }
 0x5b5   : > { %v1482_v37 = vadd.f32 1.0, %v1795_v35 }
 0x5b7   : > { %v1483_v0 = vmul.f32 %v1482_v37, %v1440_v36 }
 0x5b9   : > { %v1484_v38 = vpack.c.bf16 %v1483_v0, %v1483_v0 }
 0x5bb   : > { %1812 = vmatmul.msk.bf16.vlgmr.msra.gmra.mxu1 %vm1521_vm1, %v1484_v38 }
 0x638   : > { %v1534_v40 = vpop.f32.mrf.mxu1 }
 0x639   : > { %v1535_v41 = vadd.f32 %v1921_v39, %v1534_v40 }
 0x63b   : > { %v1538_v42 = vadd.f32 %v1535_v41, %v2373_v29 }
 0x63d   : > { %1539 = vst.msk [vmem:[%s553_s19] sm:$0xff] %vm566_vm0, %v1538_v42 }
 0x63e   : > { %1973 = shalt.err (!%p1970_p5)
}
 0x63f   : > { %1847 = dma.vmem_to_hbm [thread:$0]  (%p2157_p4), %s1555_s20, 128, %s1557_s2, %s1541_s27  }
 0x640   : > { %v1536_v29 = vpop.f32.mrf.mxu1 }
 0x641 PF: > { %s2488_s23 = sld [smem:[#allocation8_spill]]  ;;  %p1853_p6 = scmp.ge.s32.totalorder %s2024_s29, 2 }
 0x643   : > { %p1850_p7 = pnand %p1853_p6, %p2164_p8 }
 0x645   : > { %p1851_p9 = pneg %p1850_p7 }
 0x647   : > { %s1568_s18 = sand.u32 1, %s2488_s23  }
 0x648   : > { %s1569_s19 = scalar_lea.sflag [#allocation6], %s1568_s18 }
 0x649   : > { %1999 = dma.done.wait (%p1851_p9), %s1569_s19, 128  }
 0x64a   : > { %2001 = vsyncadd (%p1851_p9), %s1569_s19, 4294967168  ;;  %s30_s29 = sadd.s32 1, %s2024_s29   ;;  %s2489_s3 = sld [smem:[#allocation9_spill]] }
 0x64b   : > { %p27_p10 = scmp.ge.s32.totalorder %s30_s29, 4   ;;  %s2490_s26 = sld [smem:[#allocation12_spill]] }
 0x64c   : > { %s2491_s27 = sld [smem:[#allocation10_spill]]  ;;  %s2493_s24 = smov %s2008_s25 }
 0x64d   : > { %s2492_s28 = sld [smem:[#allocation11_spill]]  ;;  %29 = sbr.rel (!%p27_p10) target bundleno = 9 (0x9), region = 147 }
 0x650   : > { %s2494_s25 = smov %s2489_s3 }
 0x652   :  { %1575 = vsyncpa [#allocation6], 1 }
 0x653   :  { %1577 = vsyncpa [#allocation6 + $0x1], 1 }

</bundles_post_ra>
